<compile_context>
chip_gen: v7x
topology: tpu7x:2x2x1
jax: 0.10.0
libtpu: 0.0.40
codegen_flags: <defaults>
</compile_context>

<pallas_src>
import jax
import jax.numpy as jnp
from jax import lax
from jax.experimental import pallas as pl
from jax.experimental.pallas import tpu as pltpu


# ----------------------------------------------------------------------------
# Tiling helper
# ----------------------------------------------------------------------------

def _pick_tile(m, cap=1024):
    """Largest row-tile (multiple of 8, <= cap) that evenly divides M."""
    for t in (1024, 512, 256, 128, 64, 32, 16, 8):
        if t <= cap and m % t == 0:
            return t
    return m  # fallback: single full block (block == full dim is legal)


# ----------------------------------------------------------------------------
# Fused kernel: 2-phase (stats sweep, then recompute + normalize sweep)
# ----------------------------------------------------------------------------

def _make_kernel(inv_m, eps):
    def kernel(x_ref, w1_ref, b1_ref, w2_ref, gamma_ref, beta_ref, w3_ref,
               o_ref, sum_ref, ssq_ref, scale_ref, shift_ref):
        phase = pl.program_id(0)   # 0: statistics sweep, 1: output sweep
        tile = pl.program_id(1)

        @pl.when((phase == 0) & (tile == 0))
        def _():
            sum_ref[...] = jnp.zeros_like(sum_ref)
            ssq_ref[...] = jnp.zeros_like(ssq_ref)

        # conv1 (1x1) + bias -> LeakyReLU(0.2) -> conv2 (1x1); all in VMEM/vregs.
        x = x_ref[...].astype(jnp.bfloat16)                            # (TM, Cin_p)
        h1 = jnp.dot(x, w1_ref[...],
                     preferred_element_type=jnp.float32) + b1_ref[...]  # (TM, C1)
        h1 = jnp.where(h1 >= 0.0, h1, 0.2 * h1)
        h2 = jnp.dot(h1.astype(jnp.bfloat16), w2_ref[...],
                     preferred_element_type=jnp.float32)                # (TM, C2)

        @pl.when(phase == 0)
        def _():
            # Accumulate BatchNorm batch statistics in persistent VMEM scratch.
            sum_ref[...] += jnp.sum(h2, axis=0, keepdims=True)
            ssq_ref[...] += jnp.sum(h2 * h2, axis=0, keepdims=True)
            o_ref[...] = jnp.zeros_like(o_ref)   # deterministic placeholder write

        @pl.when((phase == 1) & (tile == 0))
        def _():
            # Fold batch stats (biased variance, as PyTorch training mode) into
            # per-channel scale/shift once, before the output sweep uses them.
            mean = sum_ref[...] * inv_m
            var = jnp.maximum(ssq_ref[...] * inv_m - mean * mean, 0.0)
            scale = gamma_ref[...] * lax.rsqrt(var + eps)
            scale_ref[...] = scale
            shift_ref[...] = beta_ref[...] - mean * scale

        @pl.when(phase == 1)
        def _():
            a = h2 * scale_ref[...] + shift_ref[...]                    # BN
            a = jnp.where(a >= 0.0, a, 0.2 * a)                         # LeakyReLU
            o_ref[...] = jnp.dot(a.astype(jnp.bfloat16), w3_ref[...],
                                 preferred_element_type=jnp.float32)    # (TM, 1)

    return kernel


def _fused_forward_2d(x2d, w1, b1, w2, gamma, beta, w3, tm, eps):
    M, cin_p = x2d.shape
    c1 = w1.shape[1]
    c2 = w2.shape[1]
    n_tiles = M // tm
    kernel = _make_kernel(1.0 / M, eps)
    return pl.pallas_call(
        kernel,
        out_shape=jax.ShapeDtypeStruct((M, 1), jnp.float32),
        grid=(2, n_tiles),
        in_specs=[
            pl.BlockSpec((tm, cin_p), lambda p, i: (i, 0)),   # x rows
            pl.BlockSpec((cin_p, c1), lambda p, i: (0, 0)),   # w1
            pl.BlockSpec((1, c1), lambda p, i: (0, 0)),       # b1
            pl.BlockSpec((c1, c2), lambda p, i: (0, 0)),      # w2
            pl.BlockSpec((1, c2), lambda p, i: (0, 0)),       # gamma
            pl.BlockSpec((1, c2), lambda p, i: (0, 0)),       # beta
            pl.BlockSpec((c2, 1), lambda p, i: (0, 0)),       # w3
        ],
        out_specs=pl.BlockSpec((tm, 1), lambda p, i: (i, 0)),
        scratch_shapes=[
            pltpu.VMEM((1, c2), jnp.float32),   # running sum
            pltpu.VMEM((1, c2), jnp.float32),   # running sum of squares
            pltpu.VMEM((1, c2), jnp.float32),   # folded BN scale
            pltpu.VMEM((1, c2), jnp.float32),   # folded BN shift
        ],
        compiler_params=pltpu.CompilerParams(
            dimension_semantics=("arbitrary", "arbitrary")),
    )(x2d, w1, b1, w2, gamma, beta, w3)


# ----------------------------------------------------------------------------
# Full forward (NCHW in / NCHW out, like the PyTorch module)
# ----------------------------------------------------------------------------

def pixel_discriminator_forward(params, x_nchw, eps=1e-5):
    N, Cin, H, W = x_nchw.shape
    M = N * H * W
    tm = _pick_tile(M)

    # NCHW -> NHWC -> (M, Cin) rows; pad Cin to a multiple of 8 for aligned K.
    x2d = jnp.transpose(x_nchw, (0, 2, 3, 1)).reshape(M, Cin).astype(jnp.float32)
    cin_p = max(8, ((Cin + 7) // 8) * 8)
    x2d = jnp.pad(x2d, ((0, 0), (0, cin_p - Cin)))

    ndf = params["w1"].shape[0]
    c2 = params["w2"].shape[0]            # = 2 * ndf

    # Torch conv weights (Cout, Cin, 1, 1) -> (Cin, Cout) matmul layout, bf16 operands.
    w1 = params["w1"].reshape(ndf, Cin).T                          # (Cin, ndf)
    w1 = jnp.pad(w1, ((0, cin_p - Cin), (0, 0))).astype(jnp.bfloat16)
    b1 = params["b1"].reshape(1, ndf).astype(jnp.float32)
    w2 = params["w2"].reshape(c2, ndf).T.astype(jnp.bfloat16)      # (ndf, 2ndf)
    gamma = params["gamma"].reshape(1, c2).astype(jnp.float32)
    beta = params["beta"].reshape(1, c2).astype(jnp.float32)
    w3 = params["w3"].reshape(1, c2).T.astype(jnp.bfloat16)        # (2ndf, 1)

    # TODO(synk): BatchNorm running-mean/var state updates (a training-mode side
    # effect on module buffers) are not replicated; only the forward output is.
    out = _fused_forward_2d(x2d, w1, b1, w2, gamma, beta, w3, tm, eps)   # (M, 1)

    # (M, 1) -> (N, H, W, 1) -> (N, 1, H, W)
    return jnp.transpose(out.reshape(N, H, W, 1), (0, 3, 1, 2))


# ----------------------------------------------------------------------------
# Parameter init (deterministic, normal * 0.02; BN gamma=1, beta=0)
# ----------------------------------------------------------------------------

def init_params(key, input_nc, ndf):
    k1, k2, k3, k4 = jax.random.split(key, 4)
    return {
        "w1": jax.random.normal(k1, (ndf, input_nc, 1, 1), jnp.float32) * 0.02,
        "b1": jax.random.normal(k2, (ndf,), jnp.float32) * 0.02,
        "w2": jax.random.normal(k3, (ndf * 2, ndf, 1, 1), jnp.float32) * 0.02,   # bias=False
        "gamma": jnp.ones((ndf * 2,), jnp.float32),
        "beta": jnp.zeros((ndf * 2,), jnp.float32),
        "w3": jax.random.normal(k4, (1, ndf * 2, 1, 1), jnp.float32) * 0.02,     # bias=False
    }


# ----------------------------------------------------------------------------
# Main
# ----------------------------------------------------------------------------

if __name__ == "__main__":
    # PixelDiscriminator(input_nc=3, ndf=64, norm_layer=BatchNorm2d, use_sigmoid=False)
    input_nc, ndf = 3, 64
    batch, spatial = 2, 16

    key = jax.random.PRNGKey(0)
    key, kx = jax.random.split(key)
    x = jax.random.normal(kx, (batch, input_nc, spatial, spatial), jnp.float32)

    params = init_params(key, input_nc, ndf)

    fwd = jax.jit(pixel_discriminator_forward)
    out = fwd(params, x)
    out = jax.block_until_ready(out)

    assert out.shape == (batch, 1, spatial, spatial), out.shape
    assert bool(jnp.all(jnp.isfinite(out)))
    print("KERNEL_OK")
</pallas_src>

<mosaic_0001>
module attributes {stable_mosaic.version = 11 : i64} {
  func.func @kernel(%arg0: i32, %arg1: i32, %arg2: memref<512x8xf32, #tpu.memory_space<vmem>>, %arg3: memref<8x64xbf16, #tpu.memory_space<vmem>>, %arg4: memref<1x64xf32, #tpu.memory_space<vmem>>, %arg5: memref<64x128xbf16, #tpu.memory_space<vmem>>, %arg6: memref<1x128xf32, #tpu.memory_space<vmem>>, %arg7: memref<1x128xf32, #tpu.memory_space<vmem>>, %arg8: memref<128x1xbf16, #tpu.memory_space<vmem>>, %arg9: memref<512x1xf32, #tpu.memory_space<vmem>>, %arg10: memref<1x128xf32, #tpu.memory_space<vmem>>, %arg11: memref<1x128xf32, #tpu.memory_space<vmem>>, %arg12: memref<1x128xf32, #tpu.memory_space<vmem>>, %arg13: memref<1x128xf32, #tpu.memory_space<vmem>>) attributes {dimension_semantics = [#tpu.dimension_semantics<arbitrary>, #tpu.dimension_semantics<arbitrary>], iteration_bounds = array<i64: 2, 1>, scalar_prefetch = 0 : i64, scratch_operands = 4 : i64, tpu.core_type = #tpu.core_type<tc>, window_params = [{transform_indices = @transform_0, window_bounds = array<i64: 512, 8>}, {pipeline_mode = #tpu.pipeline_mode<synchronous>, transform_indices = @transform_1, window_bounds = array<i64: 8, 64>}, {pipeline_mode = #tpu.pipeline_mode<synchronous>, transform_indices = @transform_2, window_bounds = array<i64: 1, 64>}, {pipeline_mode = #tpu.pipeline_mode<synchronous>, transform_indices = @transform_3, window_bounds = array<i64: 64, 128>}, {pipeline_mode = #tpu.pipeline_mode<synchronous>, transform_indices = @transform_4, window_bounds = array<i64: 1, 128>}, {pipeline_mode = #tpu.pipeline_mode<synchronous>, transform_indices = @transform_5, window_bounds = array<i64: 1, 128>}, {pipeline_mode = #tpu.pipeline_mode<synchronous>, transform_indices = @transform_6, window_bounds = array<i64: 128, 1>}, {transform_indices = @transform_7, window_bounds = array<i64: 512, 1>}]} {
    %c0_i32 = arith.constant 0 : i32
    %0 = arith.cmpi eq, %arg0, %c0_i32 : i32
    %c0_i32_0 = arith.constant 0 : i32
    %1 = arith.cmpi eq, %arg1, %c0_i32_0 : i32
    %2 = arith.andi %0, %1 : i1
    %3 = arith.extui %2 : i1 to i32
    %c0_i32_1 = arith.constant 0 : i32
    %4 = arith.cmpi ne, %3, %c0_i32_1 : i32
    scf.if %4 {
      %cst_18 = arith.constant 0.000000e+00 : f32
      %31 = vector.broadcast %cst_18 : f32 to vector<1x128xf32>
      %c0_19 = arith.constant 0 : index
      %c0_20 = arith.constant 0 : index
      %32 = vector.load %arg10[%c0_19, %c0_20] : memref<1x128xf32, #tpu.memory_space<vmem>>, vector<1x128xf32>
      tpu.vector_store %arg10[%c0_19, %c0_20], %31 {strides = array<i32>} : memref<1x128xf32, #tpu.memory_space<vmem>>, vector<1x128xf32>,
      %cst_21 = arith.constant 0.000000e+00 : f32
      %33 = vector.broadcast %cst_21 : f32 to vector<1x128xf32>
      %c0_22 = arith.constant 0 : index
      %c0_23 = arith.constant 0 : index
      %34 = vector.load %arg11[%c0_22, %c0_23] : memref<1x128xf32, #tpu.memory_space<vmem>>, vector<1x128xf32>
      tpu.vector_store %arg11[%c0_22, %c0_23], %33 {strides = array<i32>} : memref<1x128xf32, #tpu.memory_space<vmem>>, vector<1x128xf32>,
    } else {
    }
    %c0 = arith.constant 0 : index
    %c0_2 = arith.constant 0 : index
    %5 = vector.load %arg2[%c0, %c0_2] : memref<512x8xf32, #tpu.memory_space<vmem>>, vector<512x8xf32>
    %6 = arith.truncf %5 : vector<512x8xf32> to vector<512x8xbf16>
    %c0_3 = arith.constant 0 : index
    %c0_4 = arith.constant 0 : index
    %7 = vector.load %arg3[%c0_3, %c0_4] : memref<8x64xbf16, #tpu.memory_space<vmem>>, vector<8x64xbf16>
    %cst = arith.constant dense<0.000000e+00> : vector<512x64xf32>
    %8 = tpu.matmul %6, %7, %cst {dimension_numbers = #tpu.dot_dimension_numbers<[1], [0], [0], [1], [0, 0, 1, 1], [], []>} : vector<512x8xbf16>, vector<8x64xbf16>, vector<512x64xf32> -> vector<512x64xf32>
    %c0_5 = arith.constant 0 : index
    %c0_6 = arith.constant 0 : index
    %9 = vector.load %arg4[%c0_5, %c0_6] : memref<1x64xf32, #tpu.memory_space<vmem>>, vector<1x64xf32>
    %10 = vector.broadcast %9 : vector<1x64xf32> to vector<512x64xf32>
    %11 = arith.addf %8, %10 : vector<512x64xf32>
    %cst_7 = arith.constant 0.000000e+00 : f32
    %12 = vector.broadcast %cst_7 : f32 to vector<512x64xf32>
    %13 = arith.cmpf oge, %11, %12 : vector<512x64xf32>
    %cst_8 = arith.constant 2.000000e-01 : f32
    %14 = vector.broadcast %cst_8 : f32 to vector<512x64xf32>
    %15 = arith.mulf %14, %11 : vector<512x64xf32>
    %16 = arith.select %13, %11, %15 : vector<512x64xi1>, vector<512x64xf32>
    %17 = arith.truncf %16 : vector<512x64xf32> to vector<512x64xbf16>
    %c0_9 = arith.constant 0 : index
    %c0_10 = arith.constant 0 : index
    %18 = vector.load %arg5[%c0_9, %c0_10] : memref<64x128xbf16, #tpu.memory_space<vmem>>, vector<64x128xbf16>
    %cst_11 = arith.constant dense<0.000000e+00> : vector<512x128xf32>
    %19 = tpu.matmul %17, %18, %cst_11 {dimension_numbers = #tpu.dot_dimension_numbers<[1], [0], [0], [1], [0, 0, 1, 1], [], []>} : vector<512x64xbf16>, vector<64x128xbf16>, vector<512x128xf32> -> vector<512x128xf32>
    %c0_i32_12 = arith.constant 0 : i32
    %20 = arith.cmpi eq, %arg0, %c0_i32_12 : i32
    %21 = arith.extui %20 : i1 to i32
    %c0_i32_13 = arith.constant 0 : i32
    %22 = arith.cmpi ne, %21, %c0_i32_13 : i32
    scf.if %22 {
      %c0_18 = arith.constant 0 : index
      %c0_19 = arith.constant 0 : index
      %31 = vector.load %arg10[%c0_18, %c0_19] : memref<1x128xf32, #tpu.memory_space<vmem>>, vector<1x128xf32>
      %cst_20 = arith.constant dense<0.000000e+00> : vector<128xf32>
      %32 = vector.multi_reduction <add>, %19, %cst_20 [0] : vector<512x128xf32> to vector<128xf32>
      %33 = vector.shape_cast %32 : vector<128xf32> to vector<1x128xf32>
      %34 = arith.addf %31, %33 : vector<1x128xf32>
      %c0_21 = arith.constant 0 : index
      %c0_22 = arith.constant 0 : index
      %35 = vector.load %arg10[%c0_21, %c0_22] : memref<1x128xf32, #tpu.memory_space<vmem>>, vector<1x128xf32>
      tpu.vector_store %arg10[%c0_21, %c0_22], %34 {strides = array<i32>} : memref<1x128xf32, #tpu.memory_space<vmem>>, vector<1x128xf32>,
      %c0_23 = arith.constant 0 : index
      %c0_24 = arith.constant 0 : index
      %36 = vector.load %arg11[%c0_23, %c0_24] : memref<1x128xf32, #tpu.memory_space<vmem>>, vector<1x128xf32>
      %37 = arith.mulf %19, %19 : vector<512x128xf32>
      %cst_25 = arith.constant dense<0.000000e+00> : vector<128xf32>
      %38 = vector.multi_reduction <add>, %37, %cst_25 [0] : vector<512x128xf32> to vector<128xf32>
      %39 = vector.shape_cast %38 : vector<128xf32> to vector<1x128xf32>
      %40 = arith.addf %36, %39 : vector<1x128xf32>
      %c0_26 = arith.constant 0 : index
      %c0_27 = arith.constant 0 : index
      %41 = vector.load %arg11[%c0_26, %c0_27] : memref<1x128xf32, #tpu.memory_space<vmem>>, vector<1x128xf32>
      tpu.vector_store %arg11[%c0_26, %c0_27], %40 {strides = array<i32>} : memref<1x128xf32, #tpu.memory_space<vmem>>, vector<1x128xf32>,
      %cst_28 = arith.constant 0.000000e+00 : f32
      %42 = vector.broadcast %cst_28 : f32 to vector<512x1xf32>
      %c0_29 = arith.constant 0 : index
      %c0_30 = arith.constant 0 : index
      %43 = vector.load %arg9[%c0_29, %c0_30] : memref<512x1xf32, #tpu.memory_space<vmem>>, vector<512x1xf32>
      tpu.vector_store %arg9[%c0_29, %c0_30], %42 {strides = array<i32>} : memref<512x1xf32, #tpu.memory_space<vmem>>, vector<512x1xf32>,
    } else {
    }
    %c1_i32 = arith.constant 1 : i32
    %23 = arith.cmpi eq, %arg0, %c1_i32 : i32
    %c0_i32_14 = arith.constant 0 : i32
    %24 = arith.cmpi eq, %arg1, %c0_i32_14 : i32
    %25 = arith.andi %23, %24 : i1
    %26 = arith.extui %25 : i1 to i32
    %c0_i32_15 = arith.constant 0 : i32
    %27 = arith.cmpi ne, %26, %c0_i32_15 : i32
    scf.if %27 {
      %c0_18 = arith.constant 0 : index
      %c0_19 = arith.constant 0 : index
      %31 = vector.load %arg10[%c0_18, %c0_19] : memref<1x128xf32, #tpu.memory_space<vmem>>, vector<1x128xf32>
      %cst_20 = arith.constant 0.001953125 : f32
      %32 = vector.broadcast %cst_20 : f32 to vector<1x128xf32>
      %33 = arith.mulf %31, %32 : vector<1x128xf32>
      %c0_21 = arith.constant 0 : index
      %c0_22 = arith.constant 0 : index
      %34 = vector.load %arg11[%c0_21, %c0_22] : memref<1x128xf32, #tpu.memory_space<vmem>>, vector<1x128xf32>
      %cst_23 = arith.constant 0.001953125 : f32
      %35 = vector.broadcast %cst_23 : f32 to vector<1x128xf32>
      %36 = arith.mulf %34, %35 : vector<1x128xf32>
      %37 = arith.mulf %33, %33 : vector<1x128xf32>
      %38 = arith.subf %36, %37 : vector<1x128xf32>
      %cst_24 = arith.constant 0.000000e+00 : f32
      %39 = vector.broadcast %cst_24 : f32 to vector<1x128xf32>
      %40 = arith.maximumf %38, %39 : vector<1x128xf32>
      %c0_25 = arith.constant 0 : index
      %c0_26 = arith.constant 0 : index
      %41 = vector.load %arg6[%c0_25, %c0_26] : memref<1x128xf32, #tpu.memory_space<vmem>>, vector<1x128xf32>
      %cst_27 = arith.constant 9.99999974E-6 : f32
      %42 = vector.broadcast %cst_27 : f32 to vector<1x128xf32>
      %43 = arith.addf %40, %42 : vector<1x128xf32>
      %44 = math.rsqrt %43 : vector<1x128xf32>
      %45 = arith.mulf %41, %44 : vector<1x128xf32>
      %c0_28 = arith.constant 0 : index
      %c0_29 = arith.constant 0 : index
      %46 = vector.load %arg12[%c0_28, %c0_29] : memref<1x128xf32, #tpu.memory_space<vmem>>, vector<1x128xf32>
      tpu.vector_store %arg12[%c0_28, %c0_29], %45 {strides = array<i32>} : memref<1x128xf32, #tpu.memory_space<vmem>>, vector<1x128xf32>,
      %c0_30 = arith.constant 0 : index
      %c0_31 = arith.constant 0 : index
      %47 = vector.load %arg7[%c0_30, %c0_31] : memref<1x128xf32, #tpu.memory_space<vmem>>, vector<1x128xf32>
      %48 = arith.mulf %33, %45 : vector<1x128xf32>
      %49 = arith.subf %47, %48 : vector<1x128xf32>
      %c0_32 = arith.constant 0 : index
      %c0_33 = arith.constant 0 : index
      %50 = vector.load %arg13[%c0_32, %c0_33] : memref<1x128xf32, #tpu.memory_space<vmem>>, vector<1x128xf32>
      tpu.vector_store %arg13[%c0_32, %c0_33], %49 {strides = array<i32>} : memref<1x128xf32, #tpu.memory_space<vmem>>, vector<1x128xf32>,
    } else {
    }
    %c1_i32_16 = arith.constant 1 : i32
    %28 = arith.cmpi eq, %arg0, %c1_i32_16 : i32
    %29 = arith.extui %28 : i1 to i32
    %c0_i32_17 = arith.constant 0 : i32
    %30 = arith.cmpi ne, %29, %c0_i32_17 : i32
    scf.if %30 {
      %c0_18 = arith.constant 0 : index
      %c0_19 = arith.constant 0 : index
      %31 = vector.load %arg12[%c0_18, %c0_19] : memref<1x128xf32, #tpu.memory_space<vmem>>, vector<1x128xf32>
      %32 = vector.broadcast %31 : vector<1x128xf32> to vector<512x128xf32>
      %33 = arith.mulf %19, %32 : vector<512x128xf32>
      %c0_20 = arith.constant 0 : index
      %c0_21 = arith.constant 0 : index
      %34 = vector.load %arg13[%c0_20, %c0_21] : memref<1x128xf32, #tpu.memory_space<vmem>>, vector<1x128xf32>
      %35 = vector.broadcast %34 : vector<1x128xf32> to vector<512x128xf32>
      %36 = arith.addf %33, %35 : vector<512x128xf32>
      %cst_22 = arith.constant 0.000000e+00 : f32
      %37 = vector.broadcast %cst_22 : f32 to vector<512x128xf32>
      %38 = arith.cmpf oge, %36, %37 : vector<512x128xf32>
      %cst_23 = arith.constant 2.000000e-01 : f32
      %39 = vector.broadcast %cst_23 : f32 to vector<512x128xf32>
      %40 = arith.mulf %39, %36 : vector<512x128xf32>
      %41 = arith.select %38, %36, %40 : vector<512x128xi1>, vector<512x128xf32>
      %42 = arith.truncf %41 : vector<512x128xf32> to vector<512x128xbf16>
      %c0_24 = arith.constant 0 : index
      %c0_25 = arith.constant 0 : index
      %43 = vector.load %arg8[%c0_24, %c0_25] : memref<128x1xbf16, #tpu.memory_space<vmem>>, vector<128x1xbf16>
      %cst_26 = arith.constant dense<0.000000e+00> : vector<512x1xf32>
      %44 = tpu.matmul %42, %43, %cst_26 {dimension_numbers = #tpu.dot_dimension_numbers<[1], [0], [0], [1], [0, 0, 1, 1], [], []>} : vector<512x128xbf16>, vector<128x1xbf16>, vector<512x1xf32> -> vector<512x1xf32>
      %c0_27 = arith.constant 0 : index
      %c0_28 = arith.constant 0 : index
      %45 = vector.load %arg9[%c0_27, %c0_28] : memref<512x1xf32, #tpu.memory_space<vmem>>, vector<512x1xf32>
      tpu.vector_store %arg9[%c0_27, %c0_28], %44 {strides = array<i32>} : memref<512x1xf32, #tpu.memory_space<vmem>>, vector<512x1xf32>,
    } else {
    }
    return
  }
  func.func @transform_0(%arg0: i32, %arg1: i32) -> (i32, i32) {
    %c0_i32 = arith.constant 0 : i32
    %c0_i32_0 = arith.constant 0 : i32
    return %arg1, %c0_i32 : i32, i32
  }
  func.func @transform_1(%arg0: i32, %arg1: i32) -> (i32, i32) {
    %c0_i32 = arith.constant 0 : i32
    %c0_i32_0 = arith.constant 0 : i32
    %c0_i32_1 = arith.constant 0 : i32
    return %c0_i32, %c0_i32_0 : i32, i32
  }
  func.func @transform_2(%arg0: i32, %arg1: i32) -> (i32, i32) {
    %c0_i32 = arith.constant 0 : i32
    %c0_i32_0 = arith.constant 0 : i32
    %c0_i32_1 = arith.constant 0 : i32
    return %c0_i32, %c0_i32_0 : i32, i32
  }
  func.func @transform_3(%arg0: i32, %arg1: i32) -> (i32, i32) {
    %c0_i32 = arith.constant 0 : i32
    %c0_i32_0 = arith.constant 0 : i32
    %c0_i32_1 = arith.constant 0 : i32
    return %c0_i32, %c0_i32_0 : i32, i32
  }
  func.func @transform_4(%arg0: i32, %arg1: i32) -> (i32, i32) {
    %c0_i32 = arith.constant 0 : i32
    %c0_i32_0 = arith.constant 0 : i32
    %c0_i32_1 = arith.constant 0 : i32
    return %c0_i32, %c0_i32_0 : i32, i32
  }
  func.func @transform_5(%arg0: i32, %arg1: i32) -> (i32, i32) {
    %c0_i32 = arith.constant 0 : i32
    %c0_i32_0 = arith.constant 0 : i32
    %c0_i32_1 = arith.constant 0 : i32
    return %c0_i32, %c0_i32_0 : i32, i32
  }
  func.func @transform_6(%arg0: i32, %arg1: i32) -> (i32, i32) {
    %c0_i32 = arith.constant 0 : i32
    %c0_i32_0 = arith.constant 0 : i32
    %c0_i32_1 = arith.constant 0 : i32
    return %c0_i32, %c0_i32_0 : i32, i32
  }
  func.func @transform_7(%arg0: i32, %arg1: i32) -> (i32, i32) {
    %c0_i32 = arith.constant 0 : i32
    %c0_i32_0 = arith.constant 0 : i32
    return %arg1, %c0_i32 : i32, i32
  }
}

</mosaic_0001>

<bundles_post_ra>
// kernel: pixel_discriminator_forward.1
= control target key start
LH: loop header
LB: loop body
LE: loop exit
PB: predicated region body
PF: predicated region fallthrough
CT: control target
= control target key end

     0   :  { %s3131_s24 = smov 0   ;;  %s3133_s25 = smov 0   ;;  %s4651_s0 = inlined_call_operand.vmem [shape: f32[512,8], index: 0, kind: input, shape index: {}]   ;;  %s4652_s1 = inlined_call_operand.vmem [shape: bf16[8,64], index: 1, kind: input, shape index: {}]   ;;  %s4653_s2 = inlined_call_operand.vmem [shape: f32[1,64], index: 2, kind: input, shape index: {}]   ;;  %s4654_s3 = inlined_call_operand.vmem [shape: bf16[64,128], index: 3, kind: input, shape index: {}]   ;;  %s4655_s4 = inlined_call_operand.vmem [shape: f32[1,128], index: 4, kind: input, shape index: {}]   ;;  %s4656_s5 = inlined_call_operand.vmem [shape: f32[1,128], index: 5, kind: input, shape index: {}]   ;;  %s4657_s6 = inlined_call_operand.vmem [shape: bf16[128,1], index: 6, kind: input, shape index: {}]   ;;  %s4658_s7 = inlined_call_operand.vmem [shape: f32[512,1], index: 7, kind: output, shape index: {}]  }
   0x1   :  { %s3135_s26 = smov 0  }
   0x2 LB: > { %s29_s27 = sadd.s32 1, %s3083_s25  ;;  %p2591_p0 = scmp.ge.s32.totalorder %s3087_s26, 1  ;;  %s3087_s26 = sphi %s3135_s26, %s17_s26   ;;  %s3083_s25 = sphi %s3133_s25, %s4750_s25   ;;  %s3079_s24 = sphi %s3131_s24, %s4749_s24  }
   0x3   : > { %p31_p1 = scmp.ge.s32.totalorder %s29_s27, 2  ;;  %p250_p2 = scmp.lt.s32.totalorder %s3087_s26, 3 }
   0x5   : > { %s4752_s27 = smov (%p31_p1, %s29_s27), 0  ;;  %p251_p3 = pnand %p2591_p0, %p250_p2 }
   0x7   : > { %254 = sbr.rel (%p251_p3) target bundleno = 1100 (0x44c), region = 48 }
   0xe   : > { %p295_p4 = scmp.eq.s32.totalorder %s3079_s24, 0 }
   0xf   : > { %v3089_v0 = vmov (%p295_p4), 0.0  }
  0x10   : > { %300 = sbr.rel (!%p295_p4) target bundleno = 23 (0x17), region = 52  ;;  %301 = vst [vmem:[#allocation2] sm:$0x1] (%p295_p4), %v3089_v0  ;;  %302 = vst [vmem:[#allocation3] sm:$0x1] (%p295_p4), %v3089_v0 }
  0x17 PF: > { %v399_v1 = vld [vmem:[%s4652_s1] sm:$0xf]  ;;  %vm504_vm0 = vcmask 1043456   ;;  %v304_v3 = vld [vmem:[%s4651_s0 + $0x8] sm:$0xff]  ;;  %vm407_vm1 = vcmask 64512   ;;  %v305_v6 = vld [vmem:[%s4651_s0 + $0x10] sm:$0xff] }
  0x18   : > { %v303_v2 = vld [vmem:[%s4651_s0] sm:$0xff]  ;;  %3024 = vmatprep.subr.msk.bf16.mxu0 %vm504_vm0, %v399_v1  ;;  %v506_v4 = vsel %vm504_vm0, %v399_v1, 0  ;;  %v306_v7 = vld [vmem:[%s4651_s0 + $0x18] sm:$0xff]  ;;  %v308_v10 = vld [vmem:[%s4651_s0 + $0x28] sm:$0xff]  ;;  %vm1053_vm6 = vcmask 523264   ;;  %p2662_p5 = scmp.ne.s32.totalorder %s3079_s24, 0 }
  0x19   : > { %v367_v5 = vpack.c.bf16 %v304_v3, %v303_v2  ;;  %v307_v8 = vld [vmem:[%s4651_s0 + $0x20] sm:$0xff]  ;;  %2791 = vmatpush3.bf16.msra.mxu0 %v506_v4  ;;  %v368_v9 = vpack.c.bf16 %v306_v7, %v305_v6  ;;  %v309_v12 = vld [vmem:[%s4651_s0 + $0x30] sm:$0xff]  ;;  %v310_v13 = vld [vmem:[%s4651_s0 + $0x38] sm:$0xff] }
  0x1a   : > { %v369_v11 = vpack.c.bf16 %v308_v10, %v307_v8  ;;  %v311_v14 = vld [vmem:[%s4651_s0 + $0x40] sm:$0xff]  ;;  %v312_v15 = vld [vmem:[%s4651_s0 + $0x48] sm:$0xff]  ;;  %v370_v16 = vpack.c.bf16 %v310_v13, %v309_v12  ;;  %v313_v18 = vld [vmem:[%s4651_s0 + $0x50] sm:$0xff] }
  0x1b   : > { %2792 = vmatprep.mubr.msk.bf16.mxu0 %vm407_vm1, %v367_v5  ;;  %v371_v17 = vpack.c.bf16 %v312_v15, %v311_v14  ;;  %v314_v19 = vld [vmem:[%s4651_s0 + $0x58] sm:$0xff]  ;;  %v315_v20 = vld [vmem:[%s4651_s0 + $0x60] sm:$0xff]  ;;  %v316_v21 = vld [vmem:[%s4651_s0 + $0x68] sm:$0xff] }
  0x1c   : > { %2793 = vmatmul.mubr.msk.bf16.vlgmr.msra.gmra.mrb[0].mxu0 %vm407_vm1, %v368_v9  ;;  %v372_v22 = vpack.c.bf16 %v314_v19, %v313_v18  ;;  %v373_v23 = vpack.c.bf16 %v316_v21, %v315_v20  ;;  %v317_v24 = vld [vmem:[%s4651_s0 + $0x70] sm:$0xff]  ;;  %v318_v25 = vld [vmem:[%s4651_s0 + $0x78] sm:$0xff]  ;;  %v319_v26 = vld [vmem:[%s4651_s0 + $0x80] sm:$0xff] }
  0x1d   : > { %2796 = vmatprep.mubr.msk.bf16.mxu0 %vm407_vm1, %v369_v11  ;;  %v320_v27 = vld [vmem:[%s4651_s0 + $0x88] sm:$0xff]  ;;  %v3051_v28 = vld [vmem:[%s4654_s3] sm:$0xff]   ;;  %v374_v29 = vpack.c.bf16 %v318_v25, %v317_v24  ;;  %v321_v31 = vld [vmem:[%s4651_s0 + $0x90] sm:$0xff] }
  0x1e   : > { %2856 = vmatprep.subr.bf16.mxu1 %v3051_v28  ;;  %v375_v30 = vpack.c.bf16 %v320_v27, %v319_v26  ;;  %v322_v32 = vld [vmem:[%s4651_s0 + $0x98] sm:$0xff]  ;;  %v323_v33 = vld [vmem:[%s4651_s0 + $0xa0] sm:$0xff]  ;;  %v324_v34 = vld [vmem:[%s4651_s0 + $0xa8] sm:$0xff] }
  0x1f   : > { %2857 = vmatpush3.bf16.msra.mxu1 %v3051_v28  ;;  %v376_v35 = vpack.c.bf16 %v322_v32, %v321_v31  ;;  %v377_v36 = vpack.c.bf16 %v324_v34, %v323_v33  ;;  %v325_v37 = vld [vmem:[%s4651_s0 + $0xb0] sm:$0xff]  ;;  %v326_v38 = vld [vmem:[%s4651_s0 + $0xb8] sm:$0xff]  ;;  %v327_v39 = vld [vmem:[%s4651_s0 + $0xc0] sm:$0xff] }
  0x20   : > { %v328_v40 = vld [vmem:[%s4651_s0 + $0xc8] sm:$0xff]  ;;  %v378_v41 = vpack.c.bf16 %v326_v38, %v325_v37  ;;  %v329_v43 = vld [vmem:[%s4651_s0 + $0xd0] sm:$0xff]  ;;  %v330_v44 = vld [vmem:[%s4651_s0 + $0xd8] sm:$0xff] }
  0x21   : > { %v379_v42 = vpack.c.bf16 %v328_v40, %v327_v39  ;;  %v331_v45 = vld [vmem:[%s4651_s0 + $0xe0] sm:$0xff]  ;;  %v332_v46 = vld [vmem:[%s4651_s0 + $0xe8] sm:$0xff]  ;;  %v380_v47 = vpack.c.bf16 %v330_v44, %v329_v43  ;;  %v333_v49 = vld [vmem:[%s4651_s0 + $0xf0] sm:$0xff] }
  0x22   : > { %v381_v48 = vpack.c.bf16 %v332_v46, %v331_v45  ;;  %v334_v50 = vld [vmem:[%s4651_s0 + $0xf8] sm:$0xff]  ;;  %v335_v51 = vld [vmem:[%s4651_s0 + $0x100] sm:$0xff]  ;;  %v336_v52 = vld [vmem:[%s4651_s0 + $0x108] sm:$0xff] }
  0x23   : > { %v382_v53 = vpack.c.bf16 %v334_v50, %v333_v49  ;;  %v383_v54 = vpack.c.bf16 %v336_v52, %v335_v51  ;;  %v337_v55 = vld [vmem:[%s4651_s0 + $0x110] sm:$0xff]  ;;  %v338_v56 = vld [vmem:[%s4651_s0 + $0x118] sm:$0xff]  ;;  %v339_v57 = vld [vmem:[%s4651_s0 + $0x120] sm:$0xff] }
  0x24   : > { %2797 = vmatmul.mubr.msk.bf16.gmra.mrb[4].mxu0 %vm407_vm1, %v370_v16  ;;  %v340_v58 = vld [vmem:[%s4651_s0 + $0x128] sm:$0xff]  ;;  %v384_v59 = vpack.c.bf16 %v338_v56, %v337_v55  ;;  %v341_v61 = vld [vmem:[%s4651_s0 + $0x130] sm:$0xff]  ;;  %v342_v62 = vld [vmem:[%s4651_s0 + $0x138] sm:$0xff] }
  0x25   : > { %2800 = vmatprep.mubr.msk.bf16.mxu0 %vm407_vm1, %v371_v17  ;;  %v385_v60 = vpack.c.bf16 %v340_v58, %v339_v57  ;;  %v343_v63 = vld [vmem:[%s4651_s0 + $0x140] sm:$0xff]  ;;  %v344_v0 = vld [vmem:[%s4651_s0 + $0x148] sm:$0xff]  ;;  %v386_v1 = vpack.c.bf16 %v342_v62, %v341_v61  ;;  %v345_v3 = vld [vmem:[%s4651_s0 + $0x150] sm:$0xff] }
  0x26   : > { %v387_v2 = vpack.c.bf16 %v344_v0, %v343_v63  ;;  %v346_v4 = vld [vmem:[%s4651_s0 + $0x158] sm:$0xff]  ;;  %v347_v5 = vld [vmem:[%s4651_s0 + $0x160] sm:$0xff]  ;;  %v348_v6 = vld [vmem:[%s4651_s0 + $0x168] sm:$0xff] }
  0x27   : > { %v388_v7 = vpack.c.bf16 %v346_v4, %v345_v3  ;;  %v389_v8 = vpack.c.bf16 %v348_v6, %v347_v5  ;;  %v349_v9 = vld [vmem:[%s4651_s0 + $0x170] sm:$0xff]  ;;  %v350_v10 = vld [vmem:[%s4651_s0 + $0x178] sm:$0xff]  ;;  %v3052_v11 = vld [vmem:[%s4654_s3 + $0x8] sm:$0xff]  }
  0x28   : > { %v351_v12 = vld [vmem:[%s4651_s0 + $0x180] sm:$0xff]  ;;  %v352_v13 = vld [vmem:[%s4651_s0 + $0x188] sm:$0xff]  ;;  %2858 = vmatprep.subr.bf16.mxu1 %v3052_v11  ;;  %v390_v14 = vpack.c.bf16 %v350_v10, %v349_v9  ;;  %v3053_v16 = vld [vmem:[%s4654_s3 + $0x10] sm:$0xff]  }
  0x29   : > { %2859 = vmatpush3.bf16.msra.mxu1 %v3052_v11  ;;  %v391_v15 = vpack.c.bf16 %v352_v13, %v351_v12  ;;  %v353_v17 = vld [vmem:[%s4651_s0 + $0x190] sm:$0xff]  ;;  %v354_v18 = vld [vmem:[%s4651_s0 + $0x198] sm:$0xff]  ;;  %v355_v20 = vld [vmem:[%s4651_s0 + $0x1a0] sm:$0xff] }
  0x2a   : > { %2860 = vmatprep.subr.bf16.mxu1 %v3053_v16  ;;  %v3054_v19 = vld [vmem:[%s4654_s3 + $0x18] sm:$0xff]   ;;  %v356_v21 = vld [vmem:[%s4651_s0 + $0x1a8] sm:$0xff]  ;;  %v357_v24 = vld [vmem:[%s4651_s0 + $0x1b0] sm:$0xff] }
  0x2b   : > { %v358_v25 = vld [vmem:[%s4651_s0 + $0x1b8] sm:$0xff]  ;;  %v359_v26 = vld [vmem:[%s4651_s0 + $0x1c0] sm:$0xff]  ;;  %v360_v27 = vld [vmem:[%s4651_s0 + $0x1c8] sm:$0xff] }
  0x2c   : > { %2801 = vmatmul.mubr.msk.bf16.gmra.mrb[8].mxu0 %vm407_vm1, %v372_v22  ;;  %v392_v22 = vpack.c.bf16 %v354_v18, %v353_v17  ;;  %v394_v28 = vpack.c.bf16 %v358_v25, %v357_v24  ;;  %v362_v31 = vld [vmem:[%s4651_s0 + $0x1d8] sm:$0xff]  ;;  %v363_v32 = vld [vmem:[%s4651_s0 + $0x1e0] sm:$0xff]  ;;  %v364_v33 = vld [vmem:[%s4651_s0 + $0x1e8] sm:$0xff] }
  0x2d   : > { %2804 = vmatprep.mubr.msk.bf16.mxu0 %vm407_vm1, %v373_v23  ;;  %2861 = vmatpush3.bf16.msra.mxu1 %v3053_v16  ;;  %v393_v23 = vpack.c.bf16 %v356_v21, %v355_v20  ;;  %v366_v37 = vld [vmem:[%s4651_s0 + $0x1f8] sm:$0xff]  ;;  %v3394_v39 = vld [vmem:[%s4653_s2] ss:$0 sm:$0xff] }
  0x2e   : > { %2862 = vmatprep.subr.bf16.mxu1 %v3054_v19 }
  0x31   : > { %2863 = vmatpush3.bf16.msra.mxu1 %v3054_v19 }
  0x34   : > { %2805 = vmatmul.mubr.msk.bf16.gmra.mrb[12].mxu0 %vm407_vm1, %v374_v29  ;;  %v395_v29 = vpack.c.bf16 %v360_v27, %v359_v26 }
  0x35   : > { %2808 = vmatprep.mubr.msk.bf16.mxu0 %vm407_vm1, %v375_v30  ;;  %v361_v30 = vld [vmem:[%s4651_s0 + $0x1d0] sm:$0xff] }
  0x36   : > { %v396_v34 = vpack.c.bf16 %v362_v31, %v361_v30 }
  0x3c   : > { %2809 = vmatmul.mubr.msk.bf16.gmra.mrb[16].mxu0 %vm407_vm1, %v376_v35  ;;  %v397_v35 = vpack.c.bf16 %v364_v33, %v363_v32 }
  0x3d   : > { %2812 = vmatprep.mubr.msk.bf16.mxu0 %vm407_vm1, %v377_v36  ;;  %v365_v36 = vld [vmem:[%s4651_s0 + $0x1f0] sm:$0xff] }
  0x3e   : > { %v398_v38 = vpack.c.bf16 %v366_v37, %v365_v36 }
  0x44   : > { %2813 = vmatmul.mubr.msk.bf16.gmra.mrb[20].mxu0 %vm407_vm1, %v378_v41 }
  0x45   : > { %2816 = vmatprep.mubr.msk.bf16.mxu0 %vm407_vm1, %v379_v42 }
  0x4c   : > { %2817 = vmatmul.mubr.msk.bf16.gmra.mrb[24].mxu0 %vm407_vm1, %v380_v47 }
  0x4d   : > { %2820 = vmatprep.mubr.msk.bf16.mxu0 %vm407_vm1, %v381_v48 }
  0x54   : > { %2821 = vmatmul.mubr.msk.bf16.gmra.mrb[28].mxu0 %vm407_vm1, %v382_v53 }
  0x55   : > { %2824 = vmatprep.mubr.msk.bf16.mxu0 %vm407_vm1, %v383_v54 }
  0x5c   : > { %2825 = vmatmul.mubr.msk.bf16.gmra.mrb[32].mxu0 %vm407_vm1, %v384_v59 }
  0x5d   : > { %2828 = vmatprep.mubr.msk.bf16.mxu0 %vm407_vm1, %v385_v60 }
  0x64   : > { %2829 = vmatmul.mubr.msk.bf16.gmra.mrb[36].mxu0 %vm407_vm1, %v386_v1 }
  0x65   : > { %2832 = vmatprep.mubr.msk.bf16.mxu0 %vm407_vm1, %v387_v2 }
  0x6c   : > { %2833 = vmatmul.mubr.msk.bf16.gmra.mrb[40].mxu0 %vm407_vm1, %v388_v7 }
  0x6d   : > { %2836 = vmatprep.mubr.msk.bf16.mxu0 %vm407_vm1, %v389_v8 }
  0x74   : > { %2837 = vmatmul.mubr.msk.bf16.gmra.mrb[44].mxu0 %vm407_vm1, %v390_v14 }
  0x75   : > { %2840 = vmatprep.mubr.msk.bf16.mxu0 %vm407_vm1, %v391_v15 }
  0x7c   : > { %2841 = vmatmul.mubr.msk.bf16.gmra.mrb[48].mxu0 %vm407_vm1, %v392_v22 }
  0x7d   : > { %2844 = vmatprep.mubr.msk.bf16.mxu0 %vm407_vm1, %v393_v23 }
  0x84   : > { %2845 = vmatmul.mubr.msk.bf16.gmra.mrb[52].mxu0 %vm407_vm1, %v394_v28 }
  0x85   : > { %2848 = vmatprep.mubr.msk.bf16.mxu0 %vm407_vm1, %v395_v29 }
  0x8c   : > { %2849 = vmatmul.mubr.msk.bf16.gmra.mrb[56].mxu0 %vm407_vm1, %v396_v34 }
  0x8d   : > { %2852 = vmatprep.mubr.msk.bf16.mxu0 %vm407_vm1, %v397_v35 }
  0x94   : > { %2853 = vmatmul.mubr.msk.bf16.gmra.mrb[60].mxu0 %vm407_vm1, %v398_v38 }
  0xef   : > { %v2794_v40 = vpop.f32.mrb[0].mxu0 }
  0xf0   : > { %v551_v41 = vadd.f32 %v2794_v40, %v3394_v39  ;;  %v542_v42 = vpop.f32.mrb[1].mxu0 }
  0xf1   : > { %v543_v43 = vadd.f32 %v3394_v39, %v542_v42  ;;  %v2795_v44 = vpop.f32.mrb[2].mxu0 }
  0xf2   : > { %v863_v45 = vmul.f32 0.2, %v551_v41  ;;  %v554_v46 = vadd.f32 %v2795_v44, %v3394_v39  ;;  %v545_v47 = vpop.f32.mrb[3].mxu0  ;;  %vm799_vm2 = vcmp.ge.f32.partialorder %v551_v41, 0.0 }
  0xf3   : > { %v861_v48 = vmul.f32 0.2, %v543_v43  ;;  %v546_v49 = vadd.f32 %v3394_v39, %v545_v47  ;;  %vm797_vm4 = vcmp.ge.f32.partialorder %v543_v43, 0.0 }
  0xf4   : > { %vm800_vm3 = vcmp.ge.f32.partialorder %v554_v46, 0.0  ;;  %v864_v50 = vmul.f32 0.2, %v554_v46  ;;  %v927_v52 = vsel %vm799_vm2, %v551_v41, %v863_v45 }
  0xf5   : > { %v862_v51 = vmul.f32 0.2, %v546_v49  ;;  %vm798_vm5 = vcmp.ge.f32.partialorder %v546_v49, 0.0  ;;  %v925_v56 = vsel %vm797_vm4, %v543_v43, %v861_v48 }
  0xf6   : > { %v928_v53 = vsel %vm800_vm3, %v554_v46, %v864_v50 }
  0xf7   : > { %v990_v54 = vpack.c.bf16 %v928_v53, %v927_v52  ;;  %v2798_v55 = vpop.f32.mrb[4].mxu0  ;;  %v926_v57 = vsel %vm798_vm5, %v546_v49, %v862_v51 }
  0xf8   : > { %v567_v58 = vadd.f32 %v2798_v55, %v3394_v39  ;;  %v558_v59 = vpop.f32.mrb[5].mxu0  ;;  %v989_v60 = vpack.c.bf16 %v926_v57, %v925_v56 }
  0xf9   : > { %v559_v61 = vadd.f32 %v3394_v39, %v558_v59  ;;  %v2799_v62 = vpop.f32.mrb[6].mxu0 }
  0xfa   : > { %v867_v63 = vmul.f32 0.2, %v567_v58  ;;  %v570_v0 = vadd.f32 %v2799_v62, %v3394_v39  ;;  %v561_v1 = vpop.f32.mrb[7].mxu0  ;;  %2864 = vmatprep.mubr.msk.bf16.mxu1 %vm1053_vm6, %v989_v60  ;;  %vm803_vm7 = vcmp.ge.f32.partialorder %v567_v58, 0.0 }
  0xfb   : > { %v865_v2 = vmul.f32 0.2, %v559_v61  ;;  %v562_v3 = vadd.f32 %v3394_v39, %v561_v1  ;;  %2865 = vmatmul.mubr.msk.bf16.vlgmr.msra.gmra.mrb[0].mxu1 %vm1053_vm6, %v990_v54  ;;  %vm801_vm8 = vcmp.ge.f32.partialorder %v559_v61, 0.0 }
  0xfc   : > { %vm804_vm9 = vcmp.ge.f32.partialorder %v570_v0, 0.0  ;;  %v868_v4 = vmul.f32 0.2, %v570_v0  ;;  %v931_v6 = vsel %vm803_vm7, %v567_v58, %v867_v63 }
  0xfd   : > { %vm802_vm10 = vcmp.ge.f32.partialorder %v562_v3, 0.0  ;;  %v866_v5 = vmul.f32 0.2, %v562_v3  ;;  %v929_v8 = vsel %vm801_vm8, %v559_v61, %v865_v2 }
  0xfe   : > { %v932_v7 = vsel %vm804_vm9, %v570_v0, %v868_v4 }
  0xff   : > { %v992_v9 = vpack.c.bf16 %v932_v7, %v931_v6  ;;  %v930_v10 = vsel %vm802_vm10, %v562_v3, %v866_v5  ;;  %v2802_v11 = vpop.f32.mrb[8].mxu0 }
 0x100   : > { %v991_v12 = vpack.c.bf16 %v930_v10, %v929_v8  ;;  %v583_v13 = vadd.f32 %v2802_v11, %v3394_v39  ;;  %v574_v14 = vpop.f32.mrb[9].mxu0 }
 0x101   : > { %v575_v15 = vadd.f32 %v3394_v39, %v574_v14  ;;  %v2803_v16 = vpop.f32.mrb[10].mxu0 }
 0x102   : > { %v871_v17 = vmul.f32 0.2, %v583_v13  ;;  %v586_v18 = vadd.f32 %v2803_v16, %v3394_v39  ;;  %v577_v19 = vpop.f32.mrb[11].mxu0  ;;  %2868 = vmatprep.mubr.msk.bf16.mxu1 %vm1053_vm6, %v991_v12  ;;  %vm807_vm11 = vcmp.ge.f32.partialorder %v583_v13, 0.0 }
 0x103   : > { %v869_v20 = vmul.f32 0.2, %v575_v15  ;;  %v578_v21 = vadd.f32 %v3394_v39, %v577_v19  ;;  %2869 = vmatmul.mubr.msk.bf16.gmra.mrb[4].mxu1 %vm1053_vm6, %v992_v9  ;;  %vm805_vm12 = vcmp.ge.f32.partialorder %v575_v15, 0.0 }
 0x104   : > { %vm808_vm13 = vcmp.ge.f32.partialorder %v586_v18, 0.0  ;;  %v872_v22 = vmul.f32 0.2, %v586_v18  ;;  %v935_v24 = vsel %vm807_vm11, %v583_v13, %v871_v17 }
 0x105   : > { %vm806_vm14 = vcmp.ge.f32.partialorder %v578_v21, 0.0  ;;  %v870_v23 = vmul.f32 0.2, %v578_v21  ;;  %v933_v26 = vsel %vm805_vm12, %v575_v15, %v869_v20 }
 0x106   : > { %v936_v25 = vsel %vm808_vm13, %v586_v18, %v872_v22 }
 0x107   : > { %v994_v27 = vpack.c.bf16 %v936_v25, %v935_v24  ;;  %v934_v28 = vsel %vm806_vm14, %v578_v21, %v870_v23  ;;  %v2806_v29 = vpop.f32.mrb[12].mxu0 }
 0x108   : > { %v993_v30 = vpack.c.bf16 %v934_v28, %v933_v26  ;;  %v599_v31 = vadd.f32 %v2806_v29, %v3394_v39  ;;  %v590_v32 = vpop.f32.mrb[13].mxu0 }
 0x109   : > { %v591_v33 = vadd.f32 %v3394_v39, %v590_v32  ;;  %v2807_v34 = vpop.f32.mrb[14].mxu0 }
 0x10a   : > { %v875_v35 = vmul.f32 0.2, %v599_v31  ;;  %v602_v36 = vadd.f32 %v2807_v34, %v3394_v39  ;;  %v593_v37 = vpop.f32.mrb[15].mxu0  ;;  %2872 = vmatprep.mubr.msk.bf16.mxu1 %vm1053_vm6, %v993_v30  ;;  %vm811_vm15 = vcmp.ge.f32.partialorder %v599_v31, 0.0 }
 0x10b   : > { %v873_v38 = vmul.f32 0.2, %v591_v33  ;;  %v594_v40 = vadd.f32 %v3394_v39, %v593_v37  ;;  %2873 = vmatmul.mubr.msk.bf16.gmra.mrb[8].mxu1 %vm1053_vm6, %v994_v27  ;;  %vm809_vm0 = vcmp.ge.f32.partialorder %v591_v33, 0.0 }
 0x10c   : > { %vm812_vm1 = vcmp.ge.f32.partialorder %v602_v36, 0.0  ;;  %v876_v41 = vmul.f32 0.2, %v602_v36  ;;  %v939_v43 = vsel %vm811_vm15, %v599_v31, %v875_v35 }
 0x10d   : > { %vm810_vm2 = vcmp.ge.f32.partialorder %v594_v40, 0.0  ;;  %v874_v42 = vmul.f32 0.2, %v594_v40  ;;  %v937_v45 = vsel %vm809_vm0, %v591_v33, %v873_v38 }
 0x10e   : > { %v940_v44 = vsel %vm812_vm1, %v602_v36, %v876_v41 }
 0x10f   : > { %v996_v46 = vpack.c.bf16 %v940_v44, %v939_v43  ;;  %v938_v47 = vsel %vm810_vm2, %v594_v40, %v874_v42  ;;  %v2810_v48 = vpop.f32.mrb[16].mxu0 }
 0x110   : > { %v995_v49 = vpack.c.bf16 %v938_v47, %v937_v45  ;;  %v615_v50 = vadd.f32 %v2810_v48, %v3394_v39  ;;  %v606_v51 = vpop.f32.mrb[17].mxu0 }
 0x111   : > { %v607_v52 = vadd.f32 %v3394_v39, %v606_v51  ;;  %v2811_v53 = vpop.f32.mrb[18].mxu0 }
 0x112   : > { %v879_v54 = vmul.f32 0.2, %v615_v50  ;;  %v618_v55 = vadd.f32 %v2811_v53, %v3394_v39  ;;  %v609_v56 = vpop.f32.mrb[19].mxu0  ;;  %2876 = vmatprep.mubr.msk.bf16.mxu1 %vm1053_vm6, %v995_v49  ;;  %vm815_vm3 = vcmp.ge.f32.partialorder %v615_v50, 0.0 }
 0x113   : > { %v877_v57 = vmul.f32 0.2, %v607_v52  ;;  %v610_v58 = vadd.f32 %v3394_v39, %v609_v56  ;;  %2877 = vmatmul.mubr.msk.bf16.gmra.mrb[12].mxu1 %vm1053_vm6, %v996_v46  ;;  %vm813_vm4 = vcmp.ge.f32.partialorder %v607_v52, 0.0 }
 0x114   : > { %vm816_vm5 = vcmp.ge.f32.partialorder %v618_v55, 0.0  ;;  %v880_v59 = vmul.f32 0.2, %v618_v55  ;;  %v943_v61 = vsel %vm815_vm3, %v615_v50, %v879_v54 }
 0x115   : > { %vm814_vm7 = vcmp.ge.f32.partialorder %v610_v58, 0.0  ;;  %v878_v60 = vmul.f32 0.2, %v610_v58  ;;  %v941_v63 = vsel %vm813_vm4, %v607_v52, %v877_v57 }
 0x116   : > { %v944_v62 = vsel %vm816_vm5, %v618_v55, %v880_v59 }
 0x117   : > { %v998_v0 = vpack.c.bf16 %v944_v62, %v943_v61  ;;  %v942_v1 = vsel %vm814_vm7, %v610_v58, %v878_v60  ;;  %v2814_v2 = vpop.f32.mrb[20].mxu0 }
 0x118   : > { %v997_v3 = vpack.c.bf16 %v942_v1, %v941_v63  ;;  %v631_v4 = vadd.f32 %v2814_v2, %v3394_v39  ;;  %v622_v5 = vpop.f32.mrb[21].mxu0 }
 0x119   : > { %v623_v6 = vadd.f32 %v3394_v39, %v622_v5  ;;  %v2815_v7 = vpop.f32.mrb[22].mxu0 }
 0x11a   : > { %v883_v8 = vmul.f32 0.2, %v631_v4  ;;  %v634_v9 = vadd.f32 %v2815_v7, %v3394_v39  ;;  %v625_v10 = vpop.f32.mrb[23].mxu0  ;;  %2880 = vmatprep.mubr.msk.bf16.mxu1 %vm1053_vm6, %v997_v3  ;;  %vm819_vm8 = vcmp.ge.f32.partialorder %v631_v4, 0.0 }
 0x11b   : > { %v881_v11 = vmul.f32 0.2, %v623_v6  ;;  %v626_v12 = vadd.f32 %v3394_v39, %v625_v10  ;;  %2881 = vmatmul.mubr.msk.bf16.gmra.mrb[16].mxu1 %vm1053_vm6, %v998_v0  ;;  %vm817_vm9 = vcmp.ge.f32.partialorder %v623_v6, 0.0 }
 0x11c   : > { %vm820_vm10 = vcmp.ge.f32.partialorder %v634_v9, 0.0  ;;  %v884_v13 = vmul.f32 0.2, %v634_v9  ;;  %v947_v15 = vsel %vm819_vm8, %v631_v4, %v883_v8 }
 0x11d   : > { %vm818_vm11 = vcmp.ge.f32.partialorder %v626_v12, 0.0  ;;  %v882_v14 = vmul.f32 0.2, %v626_v12  ;;  %v945_v17 = vsel %vm817_vm9, %v623_v6, %v881_v11 }
 0x11e   : > { %v948_v16 = vsel %vm820_vm10, %v634_v9, %v884_v13 }
 0x11f   : > { %v1000_v18 = vpack.c.bf16 %v948_v16, %v947_v15  ;;  %v946_v19 = vsel %vm818_vm11, %v626_v12, %v882_v14  ;;  %v2818_v20 = vpop.f32.mrb[24].mxu0 }
 0x120   : > { %v999_v21 = vpack.c.bf16 %v946_v19, %v945_v17  ;;  %v647_v22 = vadd.f32 %v2818_v20, %v3394_v39  ;;  %v638_v23 = vpop.f32.mrb[25].mxu0 }
 0x121   : > { %v639_v24 = vadd.f32 %v3394_v39, %v638_v23  ;;  %v2819_v25 = vpop.f32.mrb[26].mxu0 }
 0x122   : > { %v887_v26 = vmul.f32 0.2, %v647_v22  ;;  %v650_v27 = vadd.f32 %v2819_v25, %v3394_v39  ;;  %v641_v28 = vpop.f32.mrb[27].mxu0  ;;  %2884 = vmatprep.mubr.msk.bf16.mxu1 %vm1053_vm6, %v999_v21  ;;  %vm823_vm12 = vcmp.ge.f32.partialorder %v647_v22, 0.0 }
 0x123   : > { %v885_v29 = vmul.f32 0.2, %v639_v24  ;;  %v642_v30 = vadd.f32 %v3394_v39, %v641_v28  ;;  %2885 = vmatmul.mubr.msk.bf16.gmra.mrb[20].mxu1 %vm1053_vm6, %v1000_v18  ;;  %vm821_vm13 = vcmp.ge.f32.partialorder %v639_v24, 0.0 }
 0x124   : > { %vm824_vm14 = vcmp.ge.f32.partialorder %v650_v27, 0.0  ;;  %v888_v31 = vmul.f32 0.2, %v650_v27  ;;  %v951_v33 = vsel %vm823_vm12, %v647_v22, %v887_v26 }
 0x125   : > { %vm822_vm15 = vcmp.ge.f32.partialorder %v642_v30, 0.0  ;;  %v886_v32 = vmul.f32 0.2, %v642_v30  ;;  %v949_v35 = vsel %vm821_vm13, %v639_v24, %v885_v29 }
 0x126   : > { %v952_v34 = vsel %vm824_vm14, %v650_v27, %v888_v31 }
 0x127   : > { %v1002_v36 = vpack.c.bf16 %v952_v34, %v951_v33  ;;  %v950_v37 = vsel %vm822_vm15, %v642_v30, %v886_v32  ;;  %v2822_v38 = vpop.f32.mrb[28].mxu0 }
 0x128   : > { %v1001_v40 = vpack.c.bf16 %v950_v37, %v949_v35  ;;  %v663_v41 = vadd.f32 %v2822_v38, %v3394_v39  ;;  %v654_v42 = vpop.f32.mrb[29].mxu0 }
 0x129   : > { %v655_v43 = vadd.f32 %v3394_v39, %v654_v42  ;;  %v2823_v44 = vpop.f32.mrb[30].mxu0 }
 0x12a   : > { %v891_v45 = vmul.f32 0.2, %v663_v41  ;;  %v666_v46 = vadd.f32 %v2823_v44, %v3394_v39  ;;  %v657_v47 = vpop.f32.mrb[31].mxu0  ;;  %2888 = vmatprep.mubr.msk.bf16.mxu1 %vm1053_vm6, %v1001_v40  ;;  %vm827_vm0 = vcmp.ge.f32.partialorder %v663_v41, 0.0 }
 0x12b   : > { %v889_v48 = vmul.f32 0.2, %v655_v43  ;;  %v658_v49 = vadd.f32 %v3394_v39, %v657_v47  ;;  %2889 = vmatmul.mubr.msk.bf16.gmra.mrb[24].mxu1 %vm1053_vm6, %v1002_v36  ;;  %vm825_vm1 = vcmp.ge.f32.partialorder %v655_v43, 0.0 }
 0x12c   : > { %vm828_vm2 = vcmp.ge.f32.partialorder %v666_v46, 0.0  ;;  %v892_v50 = vmul.f32 0.2, %v666_v46  ;;  %v955_v52 = vsel %vm827_vm0, %v663_v41, %v891_v45 }
 0x12d   : > { %vm826_vm3 = vcmp.ge.f32.partialorder %v658_v49, 0.0  ;;  %v890_v51 = vmul.f32 0.2, %v658_v49  ;;  %v953_v54 = vsel %vm825_vm1, %v655_v43, %v889_v48 }
 0x12e   : > { %v956_v53 = vsel %vm828_vm2, %v666_v46, %v892_v50 }
 0x12f   : > { %v1004_v55 = vpack.c.bf16 %v956_v53, %v955_v52  ;;  %v954_v56 = vsel %vm826_vm3, %v658_v49, %v890_v51  ;;  %v2826_v57 = vpop.f32.mrb[32].mxu0 }
 0x130   : > { %v1003_v58 = vpack.c.bf16 %v954_v56, %v953_v54  ;;  %v679_v59 = vadd.f32 %v2826_v57, %v3394_v39  ;;  %v670_v60 = vpop.f32.mrb[33].mxu0 }
 0x131   : > { %v671_v61 = vadd.f32 %v3394_v39, %v670_v60  ;;  %v2827_v62 = vpop.f32.mrb[34].mxu0 }
 0x132   : > { %v895_v63 = vmul.f32 0.2, %v679_v59  ;;  %v682_v0 = vadd.f32 %v2827_v62, %v3394_v39  ;;  %v673_v1 = vpop.f32.mrb[35].mxu0  ;;  %2892 = vmatprep.mubr.msk.bf16.mxu1 %vm1053_vm6, %v1003_v58  ;;  %vm831_vm4 = vcmp.ge.f32.partialorder %v679_v59, 0.0 }
 0x133   : > { %v893_v2 = vmul.f32 0.2, %v671_v61  ;;  %v674_v3 = vadd.f32 %v3394_v39, %v673_v1  ;;  %2893 = vmatmul.mubr.msk.bf16.gmra.mrb[28].mxu1 %vm1053_vm6, %v1004_v55  ;;  %vm829_vm5 = vcmp.ge.f32.partialorder %v671_v61, 0.0 }
 0x134   : > { %vm832_vm7 = vcmp.ge.f32.partialorder %v682_v0, 0.0  ;;  %v896_v4 = vmul.f32 0.2, %v682_v0  ;;  %v959_v6 = vsel %vm831_vm4, %v679_v59, %v895_v63 }
 0x135   : > { %vm830_vm8 = vcmp.ge.f32.partialorder %v674_v3, 0.0  ;;  %v894_v5 = vmul.f32 0.2, %v674_v3  ;;  %v957_v8 = vsel %vm829_vm5, %v671_v61, %v893_v2 }
 0x136   : > { %v960_v7 = vsel %vm832_vm7, %v682_v0, %v896_v4 }
 0x137   : > { %v1006_v9 = vpack.c.bf16 %v960_v7, %v959_v6  ;;  %v958_v10 = vsel %vm830_vm8, %v674_v3, %v894_v5  ;;  %v2830_v11 = vpop.f32.mrb[36].mxu0 }
 0x138   : > { %v1005_v12 = vpack.c.bf16 %v958_v10, %v957_v8  ;;  %v695_v13 = vadd.f32 %v2830_v11, %v3394_v39  ;;  %v686_v14 = vpop.f32.mrb[37].mxu0 }
 0x139   : > { %v687_v15 = vadd.f32 %v3394_v39, %v686_v14  ;;  %v2831_v16 = vpop.f32.mrb[38].mxu0 }
 0x13a   : > { %v899_v17 = vmul.f32 0.2, %v695_v13  ;;  %v698_v18 = vadd.f32 %v2831_v16, %v3394_v39  ;;  %v689_v19 = vpop.f32.mrb[39].mxu0  ;;  %2896 = vmatprep.mubr.msk.bf16.mxu1 %vm1053_vm6, %v1005_v12  ;;  %vm835_vm9 = vcmp.ge.f32.partialorder %v695_v13, 0.0 }
 0x13b   : > { %v897_v20 = vmul.f32 0.2, %v687_v15  ;;  %v690_v21 = vadd.f32 %v3394_v39, %v689_v19  ;;  %2897 = vmatmul.mubr.msk.bf16.gmra.mrb[32].mxu1 %vm1053_vm6, %v1006_v9  ;;  %vm833_vm10 = vcmp.ge.f32.partialorder %v687_v15, 0.0 }
 0x13c   : > { %vm836_vm11 = vcmp.ge.f32.partialorder %v698_v18, 0.0  ;;  %v900_v22 = vmul.f32 0.2, %v698_v18  ;;  %v963_v24 = vsel %vm835_vm9, %v695_v13, %v899_v17 }
 0x13d   : > { %vm834_vm12 = vcmp.ge.f32.partialorder %v690_v21, 0.0  ;;  %v898_v23 = vmul.f32 0.2, %v690_v21  ;;  %v961_v26 = vsel %vm833_vm10, %v687_v15, %v897_v20 }
 0x13e   : > { %v964_v25 = vsel %vm836_vm11, %v698_v18, %v900_v22 }
 0x13f   : > { %v1008_v27 = vpack.c.bf16 %v964_v25, %v963_v24  ;;  %v962_v28 = vsel %vm834_vm12, %v690_v21, %v898_v23  ;;  %v2834_v29 = vpop.f32.mrb[40].mxu0 }
 0x140   : > { %v1007_v30 = vpack.c.bf16 %v962_v28, %v961_v26  ;;  %v711_v31 = vadd.f32 %v2834_v29, %v3394_v39  ;;  %v702_v32 = vpop.f32.mrb[41].mxu0 }
 0x141   : > { %v703_v33 = vadd.f32 %v3394_v39, %v702_v32  ;;  %v2835_v34 = vpop.f32.mrb[42].mxu0 }
 0x142   : > { %v903_v35 = vmul.f32 0.2, %v711_v31  ;;  %v714_v36 = vadd.f32 %v2835_v34, %v3394_v39  ;;  %v705_v37 = vpop.f32.mrb[43].mxu0  ;;  %2900 = vmatprep.mubr.msk.bf16.mxu1 %vm1053_vm6, %v1007_v30  ;;  %vm839_vm13 = vcmp.ge.f32.partialorder %v711_v31, 0.0 }
 0x143   : > { %v901_v38 = vmul.f32 0.2, %v703_v33  ;;  %v706_v40 = vadd.f32 %v3394_v39, %v705_v37  ;;  %2901 = vmatmul.mubr.msk.bf16.gmra.mrb[36].mxu1 %vm1053_vm6, %v1008_v27  ;;  %vm837_vm14 = vcmp.ge.f32.partialorder %v703_v33, 0.0 }
 0x144   : > { %vm840_vm15 = vcmp.ge.f32.partialorder %v714_v36, 0.0  ;;  %v904_v41 = vmul.f32 0.2, %v714_v36  ;;  %v967_v43 = vsel %vm839_vm13, %v711_v31, %v903_v35 }
 0x145   : > { %vm838_vm0 = vcmp.ge.f32.partialorder %v706_v40, 0.0  ;;  %v902_v42 = vmul.f32 0.2, %v706_v40  ;;  %v965_v45 = vsel %vm837_vm14, %v703_v33, %v901_v38 }
 0x146   : > { %v968_v44 = vsel %vm840_vm15, %v714_v36, %v904_v41 }
 0x147   : > { %v1010_v46 = vpack.c.bf16 %v968_v44, %v967_v43  ;;  %v966_v47 = vsel %vm838_vm0, %v706_v40, %v902_v42  ;;  %v2838_v48 = vpop.f32.mrb[44].mxu0 }
 0x148   : > { %v1009_v49 = vpack.c.bf16 %v966_v47, %v965_v45  ;;  %v727_v50 = vadd.f32 %v2838_v48, %v3394_v39  ;;  %v718_v51 = vpop.f32.mrb[45].mxu0 }
 0x149   : > { %v719_v52 = vadd.f32 %v3394_v39, %v718_v51  ;;  %v2839_v53 = vpop.f32.mrb[46].mxu0 }
 0x14a   : > { %v907_v54 = vmul.f32 0.2, %v727_v50  ;;  %v730_v55 = vadd.f32 %v2839_v53, %v3394_v39  ;;  %v721_v56 = vpop.f32.mrb[47].mxu0  ;;  %2904 = vmatprep.mubr.msk.bf16.mxu1 %vm1053_vm6, %v1009_v49  ;;  %vm843_vm1 = vcmp.ge.f32.partialorder %v727_v50, 0.0 }
 0x14b   : > { %v905_v57 = vmul.f32 0.2, %v719_v52  ;;  %v722_v58 = vadd.f32 %v3394_v39, %v721_v56  ;;  %2905 = vmatmul.mubr.msk.bf16.gmra.mrb[40].mxu1 %vm1053_vm6, %v1010_v46  ;;  %vm841_vm2 = vcmp.ge.f32.partialorder %v719_v52, 0.0 }
 0x14c   : > { %vm844_vm3 = vcmp.ge.f32.partialorder %v730_v55, 0.0  ;;  %v908_v59 = vmul.f32 0.2, %v730_v55  ;;  %v971_v61 = vsel %vm843_vm1, %v727_v50, %v907_v54 }
 0x14d   : > { %vm842_vm4 = vcmp.ge.f32.partialorder %v722_v58, 0.0  ;;  %v906_v60 = vmul.f32 0.2, %v722_v58  ;;  %v969_v63 = vsel %vm841_vm2, %v719_v52, %v905_v57 }
 0x14e   : > { %v972_v62 = vsel %vm844_vm3, %v730_v55, %v908_v59 }
 0x14f   : > { %v1012_v0 = vpack.c.bf16 %v972_v62, %v971_v61  ;;  %v970_v1 = vsel %vm842_vm4, %v722_v58, %v906_v60  ;;  %v2842_v2 = vpop.f32.mrb[48].mxu0 }
 0x150   : > { %v1011_v3 = vpack.c.bf16 %v970_v1, %v969_v63  ;;  %v743_v4 = vadd.f32 %v2842_v2, %v3394_v39  ;;  %v734_v5 = vpop.f32.mrb[49].mxu0 }
 0x151   : > { %v735_v6 = vadd.f32 %v3394_v39, %v734_v5  ;;  %v2843_v7 = vpop.f32.mrb[50].mxu0 }
 0x152   : > { %v911_v8 = vmul.f32 0.2, %v743_v4  ;;  %v746_v9 = vadd.f32 %v2843_v7, %v3394_v39  ;;  %v737_v10 = vpop.f32.mrb[51].mxu0  ;;  %2908 = vmatprep.mubr.msk.bf16.mxu1 %vm1053_vm6, %v1011_v3  ;;  %vm847_vm5 = vcmp.ge.f32.partialorder %v743_v4, 0.0 }
 0x153   : > { %v909_v11 = vmul.f32 0.2, %v735_v6  ;;  %v738_v12 = vadd.f32 %v3394_v39, %v737_v10  ;;  %2909 = vmatmul.mubr.msk.bf16.gmra.mrb[44].mxu1 %vm1053_vm6, %v1012_v0  ;;  %vm845_vm7 = vcmp.ge.f32.partialorder %v735_v6, 0.0 }
 0x154   : > { %vm848_vm8 = vcmp.ge.f32.partialorder %v746_v9, 0.0  ;;  %v912_v13 = vmul.f32 0.2, %v746_v9  ;;  %v975_v15 = vsel %vm847_vm5, %v743_v4, %v911_v8 }
 0x155   : > { %vm846_vm9 = vcmp.ge.f32.partialorder %v738_v12, 0.0  ;;  %v910_v14 = vmul.f32 0.2, %v738_v12  ;;  %v973_v17 = vsel %vm845_vm7, %v735_v6, %v909_v11 }
 0x156   : > { %v976_v16 = vsel %vm848_vm8, %v746_v9, %v912_v13 }
 0x157   : > { %v1014_v18 = vpack.c.bf16 %v976_v16, %v975_v15  ;;  %v974_v19 = vsel %vm846_vm9, %v738_v12, %v910_v14  ;;  %v2846_v20 = vpop.f32.mrb[52].mxu0 }
 0x158   : > { %v1013_v21 = vpack.c.bf16 %v974_v19, %v973_v17  ;;  %v759_v22 = vadd.f32 %v2846_v20, %v3394_v39  ;;  %v750_v23 = vpop.f32.mrb[53].mxu0 }
 0x159   : > { %v751_v24 = vadd.f32 %v3394_v39, %v750_v23  ;;  %v2847_v25 = vpop.f32.mrb[54].mxu0 }
 0x15a   : > { %v915_v26 = vmul.f32 0.2, %v759_v22  ;;  %v762_v27 = vadd.f32 %v2847_v25, %v3394_v39  ;;  %v753_v28 = vpop.f32.mrb[55].mxu0  ;;  %2912 = vmatprep.mubr.msk.bf16.mxu1 %vm1053_vm6, %v1013_v21  ;;  %vm851_vm10 = vcmp.ge.f32.partialorder %v759_v22, 0.0 }
 0x15b   : > { %v913_v29 = vmul.f32 0.2, %v751_v24  ;;  %v754_v30 = vadd.f32 %v3394_v39, %v753_v28  ;;  %2913 = vmatmul.mubr.msk.bf16.gmra.mrb[48].mxu1 %vm1053_vm6, %v1014_v18  ;;  %vm849_vm11 = vcmp.ge.f32.partialorder %v751_v24, 0.0 }
 0x15c   : > { %vm852_vm12 = vcmp.ge.f32.partialorder %v762_v27, 0.0  ;;  %v916_v31 = vmul.f32 0.2, %v762_v27  ;;  %v979_v33 = vsel %vm851_vm10, %v759_v22, %v915_v26 }
 0x15d   : > { %vm850_vm13 = vcmp.ge.f32.partialorder %v754_v30, 0.0  ;;  %v914_v32 = vmul.f32 0.2, %v754_v30  ;;  %v977_v35 = vsel %vm849_vm11, %v751_v24, %v913_v29 }
 0x15e   : > { %v980_v34 = vsel %vm852_vm12, %v762_v27, %v916_v31 }
 0x15f   : > { %v1016_v36 = vpack.c.bf16 %v980_v34, %v979_v33  ;;  %v978_v37 = vsel %vm850_vm13, %v754_v30, %v914_v32  ;;  %v2850_v38 = vpop.f32.mrb[56].mxu0 }
 0x160   : > { %v1015_v40 = vpack.c.bf16 %v978_v37, %v977_v35  ;;  %v775_v41 = vadd.f32 %v2850_v38, %v3394_v39  ;;  %v766_v42 = vpop.f32.mrb[57].mxu0 }
 0x161   : > { %v767_v43 = vadd.f32 %v3394_v39, %v766_v42  ;;  %v2851_v44 = vpop.f32.mrb[58].mxu0 }
 0x162   : > { %v919_v45 = vmul.f32 0.2, %v775_v41  ;;  %v778_v46 = vadd.f32 %v2851_v44, %v3394_v39  ;;  %v769_v47 = vpop.f32.mrb[59].mxu0  ;;  %2916 = vmatprep.mubr.msk.bf16.mxu1 %vm1053_vm6, %v1015_v40  ;;  %vm855_vm14 = vcmp.ge.f32.partialorder %v775_v41, 0.0 }
 0x163   : > { %v917_v48 = vmul.f32 0.2, %v767_v43  ;;  %v770_v49 = vadd.f32 %v3394_v39, %v769_v47  ;;  %2917 = vmatmul.mubr.msk.bf16.gmra.mrb[52].mxu1 %vm1053_vm6, %v1016_v36  ;;  %vm853_vm15 = vcmp.ge.f32.partialorder %v767_v43, 0.0 }
 0x164   : > { %vm856_vm0 = vcmp.ge.f32.partialorder %v778_v46, 0.0  ;;  %v920_v50 = vmul.f32 0.2, %v778_v46  ;;  %v983_v52 = vsel %vm855_vm14, %v775_v41, %v919_v45 }
 0x165   : > { %vm854_vm1 = vcmp.ge.f32.partialorder %v770_v49, 0.0  ;;  %v918_v51 = vmul.f32 0.2, %v770_v49  ;;  %v981_v54 = vsel %vm853_vm15, %v767_v43, %v917_v48 }
 0x166   : > { %v984_v53 = vsel %vm856_vm0, %v778_v46, %v920_v50 }
 0x167   : > { %v1018_v55 = vpack.c.bf16 %v984_v53, %v983_v52  ;;  %v982_v56 = vsel %vm854_vm1, %v770_v49, %v918_v51  ;;  %v2854_v57 = vpop.f32.mrb[60].mxu0 }
 0x168   : > { %v1017_v58 = vpack.c.bf16 %v982_v56, %v981_v54  ;;  %v791_v59 = vadd.f32 %v2854_v57, %v3394_v39  ;;  %v782_v60 = vpop.f32.mrb[61].mxu0 }
 0x169   : > { %v783_v61 = vadd.f32 %v3394_v39, %v782_v60  ;;  %v2855_v62 = vpop.f32.mrb[62].mxu0 }
 0x16a   : > { %v923_v63 = vmul.f32 0.2, %v791_v59  ;;  %v794_v0 = vadd.f32 %v2855_v62, %v3394_v39  ;;  %v785_v1 = vpop.f32.mrb[63].mxu0  ;;  %2920 = vmatprep.mubr.msk.bf16.mxu1 %vm1053_vm6, %v1017_v58  ;;  %vm859_vm2 = vcmp.ge.f32.partialorder %v791_v59, 0.0 }
 0x16b   : > { %v921_v2 = vmul.f32 0.2, %v783_v61  ;;  %v786_v3 = vadd.f32 %v3394_v39, %v785_v1  ;;  %2921 = vmatmul.mubr.msk.bf16.gmra.mrb[56].mxu1 %vm1053_vm6, %v1018_v55  ;;  %vm857_vm3 = vcmp.ge.f32.partialorder %v783_v61, 0.0 }
 0x16c   : > { %vm860_vm4 = vcmp.ge.f32.partialorder %v794_v0, 0.0  ;;  %v924_v4 = vmul.f32 0.2, %v794_v0  ;;  %v987_v6 = vsel %vm859_vm2, %v791_v59, %v923_v63 }
 0x16d   : > { %vm858_vm5 = vcmp.ge.f32.partialorder %v786_v3, 0.0  ;;  %v922_v5 = vmul.f32 0.2, %v786_v3  ;;  %v985_v8 = vsel %vm857_vm3, %v783_v61, %v921_v2 }
 0x16e   : > { %v988_v7 = vsel %vm860_vm4, %v794_v0, %v924_v4 }
 0x16f   : > { %v1020_v9 = vpack.c.bf16 %v988_v7, %v987_v6  ;;  %v986_v10 = vsel %vm858_vm5, %v786_v3, %v922_v5 }
 0x170   : > { %v1019_v11 = vpack.c.bf16 %v986_v10, %v985_v8 }
 0x172   : > { %2924 = vmatprep.mubr.msk.bf16.mxu1 %vm1053_vm6, %v1019_v11 }
 0x173   : > { %2925 = vmatmul.mubr.msk.bf16.gmra.mrb[60].mxu1 %vm1053_vm6, %v1020_v9  ;;  %vm1650_vm6 = vcmask (!%p2662_p5), 7168  }
 0x1ce   : > { %v3492_v12 = vpop.f32.mrb[0].mxu1 }
 0x1cf   : > { %4685 = vst [vmem:[#allocation6_spill] sm:$0xff] %v3492_v12  ;;  %v3494_v39 = vpop.f32.mrb[1].mxu1 }
 0x1d0   : > { %4686 = vst [vmem:[#allocation7_spill] sm:$0xff] %v3494_v39  ;;  %v3496_v13 = vpop.f32.mrb[2].mxu1 }
 0x1d1   : > { %v3498_v14 = vpop.f32.mrb[3].mxu1 }
 0x1d2   : > { %4687 = vst [vmem:[#allocation8_spill] sm:$0xff] %v3498_v14 }
 0x1d6   : > { %v3500_v15 = vpop.f32.mrb[4].mxu1 }
 0x1d7   : > { %v3502_v16 = vpop.f32.mrb[5].mxu1 }
 0x1d8   : > { %v3504_v17 = vpop.f32.mrb[6].mxu1 }
 0x1d9   : > { %v3506_v18 = vpop.f32.mrb[7].mxu1 }
 0x1de   : > { %v3508_v19 = vpop.f32.mrb[8].mxu1 }
 0x1df   : > { %v3510_v20 = vpop.f32.mrb[9].mxu1 }
 0x1e0   : > { %v3512_v21 = vpop.f32.mrb[10].mxu1 }
 0x1e1   : > { %v3514_v22 = vpop.f32.mrb[11].mxu1 }
 0x1e6   : > { %v3516_v23 = vpop.f32.mrb[12].mxu1 }
 0x1e7   : > { %v3518_v24 = vpop.f32.mrb[13].mxu1 }
 0x1e8   : > { %v3520_v25 = vpop.f32.mrb[14].mxu1 }
 0x1e9   : > { %v3522_v26 = vpop.f32.mrb[15].mxu1 }
 0x1ee   : > { %v3524_v27 = vpop.f32.mrb[16].mxu1 }
 0x1ef   : > { %v3526_v28 = vpop.f32.mrb[17].mxu1 }
 0x1f0   : > { %v3528_v29 = vpop.f32.mrb[18].mxu1 }
 0x1f1   : > { %v3530_v30 = vpop.f32.mrb[19].mxu1 }
 0x1f6   : > { %v3532_v31 = vpop.f32.mrb[20].mxu1 }
 0x1f7   : > { %4688 = vst [vmem:[#allocation9_spill] sm:$0xff] %v3532_v31  ;;  %v3534_v32 = vpop.f32.mrb[21].mxu1 }
 0x1f8   : > { %v3536_v33 = vpop.f32.mrb[22].mxu1 }
 0x1f9   : > { %4689 = vst [vmem:[#allocation10_spill] sm:$0xff] %v3536_v33  ;;  %v3538_v34 = vpop.f32.mrb[23].mxu1 }
 0x1fa   : > { %4690 = vst [vmem:[#allocation11_spill] sm:$0xff] %v3538_v34 }
 0x1fe   : > { %v3540_v35 = vpop.f32.mrb[24].mxu1 }
 0x1ff   : > { %4691 = vst [vmem:[#allocation12_spill] sm:$0xff] %v3540_v35  ;;  %v3542_v36 = vpop.f32.mrb[25].mxu1 }
 0x200   : > { %4692 = vst [vmem:[#allocation13_spill] sm:$0xff] %v3542_v36  ;;  %v3544_v37 = vpop.f32.mrb[26].mxu1 }
 0x201   : > { %4693 = vst [vmem:[#allocation14_spill] sm:$0xff] %v3544_v37  ;;  %v3546_v38 = vpop.f32.mrb[27].mxu1 }
 0x202   : > { %4694 = vst [vmem:[#allocation15_spill] sm:$0xff] %v3546_v38 }
 0x206   : > { %v3548_v40 = vpop.f32.mrb[28].mxu1 }
 0x207   : > { %4695 = vst [vmem:[#allocation16_spill] sm:$0xff] %v3548_v40  ;;  %v3550_v41 = vpop.f32.mrb[29].mxu1 }
 0x208   : > { %4696 = vst [vmem:[#allocation17_spill] sm:$0xff] %v3550_v41  ;;  %v3552_v42 = vpop.f32.mrb[30].mxu1 }
 0x209   : > { %4697 = vst [vmem:[#allocation18_spill] sm:$0xff] %v3552_v42  ;;  %v3554_v43 = vpop.f32.mrb[31].mxu1 }
 0x20a   : > { %4698 = vst [vmem:[#allocation19_spill] sm:$0xff] %v3554_v43 }
 0x20e   : > { %v3556_v44 = vpop.f32.mrb[32].mxu1 }
 0x20f   : > { %v3558_v45 = vpop.f32.mrb[33].mxu1 }
 0x210   : > { %v3560_v46 = vpop.f32.mrb[34].mxu1 }
 0x211   : > { %v3562_v47 = vpop.f32.mrb[35].mxu1 }
 0x216   : > { %v3564_v48 = vpop.f32.mrb[36].mxu1 }
 0x217   : > { %v3566_v49 = vpop.f32.mrb[37].mxu1 }
 0x218   : > { %v3568_v50 = vpop.f32.mrb[38].mxu1 }
 0x219   : > { %v3570_v51 = vpop.f32.mrb[39].mxu1 }
 0x21e   : > { %v3572_v52 = vpop.f32.mrb[40].mxu1 }
 0x21f   : > { %v3574_v53 = vpop.f32.mrb[41].mxu1 }
 0x220   : > { %v3576_v54 = vpop.f32.mrb[42].mxu1 }
 0x221   : > { %v3578_v55 = vpop.f32.mrb[43].mxu1 }
 0x226   : > { %v3580_v56 = vpop.f32.mrb[44].mxu1 }
 0x227   : > { %v3582_v57 = vpop.f32.mrb[45].mxu1 }
 0x228   : > { %v3584_v58 = vpop.f32.mrb[46].mxu1 }
 0x229   : > { %v3586_v59 = vpop.f32.mrb[47].mxu1 }
 0x22e   : > { %v3588_v60 = vpop.f32.mrb[48].mxu1 }
 0x22f   : > { %v3590_v61 = vpop.f32.mrb[49].mxu1 }
 0x230   : > { %v3592_v62 = vpop.f32.mrb[50].mxu1 }
 0x231   : > { %v3594_v63 = vpop.f32.mrb[51].mxu1 }
 0x236   : > { %v3596_v0 = vpop.f32.mrb[52].mxu1 }
 0x237   : > { %4699 = vst [vmem:[#allocation20_spill] sm:$0xff] %v3596_v0  ;;  %v3598_v1 = vpop.f32.mrb[53].mxu1  ;;  %v1516_v0 = vmul.f32 (!%p2662_p5), %v3498_v14, %v3498_v14 }
 0x238   : > { %4700 = vst [vmem:[#allocation21_spill] sm:$0xff] %v3598_v1  ;;  %v3600_v2 = vpop.f32.mrb[54].mxu1 }
 0x239   : > { %4701 = vst [vmem:[#allocation22_spill] sm:$0xff] %v3600_v2  ;;  %v3602_v3 = vpop.f32.mrb[55].mxu1  ;;  %v1515_v2 = vmul.f32 (!%p2662_p5), %v3494_v39, %v3494_v39 }
 0x23a   : > { %4702 = vst [vmem:[#allocation23_spill] sm:$0xff] %v3602_v3 }
 0x23e   : > { %v3604_v4 = vpop.f32.mrb[56].mxu1 }
 0x23f   : > { %4703 = vst [vmem:[#allocation24_spill] sm:$0xff] %v3604_v4  ;;  %v3606_v5 = vpop.f32.mrb[57].mxu1  ;;  %v1443_v4 = vadd.f32 (!%p2662_p5), %v3498_v14, %v3494_v39 }
 0x240   : > { %4704 = vst [vmem:[#allocation25_spill] sm:$0xff] %v3606_v5  ;;  %v3608_v6 = vpop.f32.mrb[58].mxu1 }
 0x241   : > { %4705 = vst [vmem:[#allocation26_spill] sm:$0xff] %v3608_v6  ;;  %v3610_v7 = vpop.f32.mrb[59].mxu1  ;;  %v1444_v5 = vadd.f32 (!%p2662_p5), %v3492_v12, %v1443_v4 }
 0x242   : > { %4706 = vst [vmem:[#allocation27_spill] sm:$0xff] %v3610_v7 }
 0x243   : > { %v1445_v6 = vadd.f32 (!%p2662_p5), %v3496_v13, %v1444_v5  ;;  %v1517_v5 = vmul.f32 (!%p2662_p5), %v3492_v12, %v3492_v12 }
 0x244   : > { %1441 = sbr.rel (%p2662_p5) target bundleno = 752 (0x2f0), region = 56 }
 0x245   : > { %v1446_v7 = vadd.f32 (!%p2662_p5), %v1445_v6, %v3502_v16 }
 0x246   : > { %v3612_v8 = vpop.f32.mrb[60].mxu1 }
 0x247   : > { %4707 = vst [vmem:[#allocation28_spill] sm:$0xff] %v3612_v8  ;;  %v3614_v9 = vpop.f32.mrb[61].mxu1  ;;  %v1447_v8 = vadd.f32 (!%p2662_p5), %v1446_v7, %v3506_v18  ;;  %v1518_v7 = vmul.f32 (!%p2662_p5), %v3496_v13, %v3496_v13 }
 0x248   : > { %4708 = vst [vmem:[#allocation29_spill] sm:$0xff] %v3614_v9  ;;  %v3616_v10 = vpop.f32.mrb[62].mxu1 }
 0x249   : > { %4709 = vst [vmem:[#allocation30_spill] sm:$0xff] %v3616_v10  ;;  %v3618_v11 = vpop.f32.mrb[63].mxu1  ;;  %v1448_v9 = vadd.f32 (!%p2662_p5), %v3500_v15, %v1447_v8  ;;  %v1579_v8 = vadd.f32 (!%p2662_p5), %v1516_v0, %v1515_v2  ;;  %v1522_v2 = vmul.f32 (!%p2662_p5), %v3504_v17, %v3504_v17 }
 0x24a   : > { %4710 = vst [vmem:[#allocation31_spill] sm:$0xff] %v3618_v11 }
 0x24b   : > { %v1449_v10 = vadd.f32 %v3504_v17, %v1448_v9  ;;  %v1580_v39 = vadd.f32 %v1579_v8, %v1517_v5  ;;  %v3655_v8 = vmul.f32 %v3510_v20, %v3510_v20 }
 0x24d   : > { %v1450_v11 = vadd.f32 %v1449_v10, %v3510_v20  ;;  %v1519_v10 = vmul.f32 %v3502_v16, %v3502_v16  ;;  %v1581_v14 = vadd.f32 %v1580_v39, %v1518_v7  ;;  %v1525_v7 = vmul.f32 %v3508_v19, %v3508_v19 }
 0x24f   : > { %v1451_v4 = vadd.f32 %v1450_v11, %v3514_v22  ;;  %v1520_v11 = vmul.f32 %v3506_v18, %v3506_v18  ;;  %v1582_v1 = vadd.f32 %v1581_v14, %v1519_v10  ;;  %v3662_v14 = vmul.f32 %v3514_v22, %v3514_v22 }
 0x251   : > { %v1452_v6 = vadd.f32 %v3508_v19, %v1451_v4  ;;  %v1521_v4 = vmul.f32 %v3500_v15, %v3500_v15 }
 0x253   : > { %v1453_v9 = vadd.f32 %v3512_v21, %v1452_v6  ;;  %v1583_v6 = vadd.f32 %v1582_v1, %v1520_v11 }
 0x255   : > { %v1454_v3 = vadd.f32 %v1453_v9, %v3518_v24  ;;  %v1584_v9 = vadd.f32 %v1583_v6, %v1521_v4  ;;  %v1526_v4 = vmul.f32 %v3512_v21, %v3512_v21  ;;  %v1527_v6 = vmul.f32 %v3518_v24, %v3518_v24 }
 0x257   : > { %v1455_v12 = vadd.f32 %v1454_v3, %v3522_v26  ;;  %v3090_v3 = vmov 0.0  }
 0x258   : > { %1651 = vst.msk [vmem:[%s4658_s7] sm:$0xff] %vm1650_vm6, %v3090_v3  ;;  %1652 = vst.msk [vmem:[%s4658_s7 + $0x8] sm:$0xff] %vm1650_vm6, %v3090_v3 }
 0x259   : > { %v1456_v0 = vadd.f32 %v3516_v23, %v1455_v12  ;;  %v3664_v12 = vadd.f32 %v1584_v9, %v1522_v2  ;;  %1653 = vst.msk [vmem:[%s4658_s7 + $0x10] sm:$0xff] %vm1650_vm6, %v3090_v3  ;;  %1654 = vst.msk [vmem:[%s4658_s7 + $0x18] sm:$0xff] %vm1650_vm6, %v3090_v3 }
 0x25a   : > { %1655 = vst.msk [vmem:[%s4658_s7 + $0x20] sm:$0xff] %vm1650_vm6, %v3090_v3  ;;  %1656 = vst.msk [vmem:[%s4658_s7 + $0x28] sm:$0xff] %vm1650_vm6, %v3090_v3 }
 0x25b   : > { %v1457_v5 = vadd.f32 %v3520_v25, %v1456_v0  ;;  %1657 = vst.msk [vmem:[%s4658_s7 + $0x30] sm:$0xff] %vm1650_vm6, %v3090_v3  ;;  %1658 = vst.msk [vmem:[%s4658_s7 + $0x38] sm:$0xff] %vm1650_vm6, %v3090_v3  ;;  %v1586_v10 = vadd.f32 %v3664_v12, %v3655_v8  ;;  %v1529_v12 = vmul.f32 %v3516_v23, %v3516_v23 }
 0x25c   : > { %1659 = vst.msk [vmem:[%s4658_s7 + $0x40] sm:$0xff] %vm1650_vm6, %v3090_v3  ;;  %1660 = vst.msk [vmem:[%s4658_s7 + $0x48] sm:$0xff] %vm1650_vm6, %v3090_v3 }
 0x25d   : > { %v3658_v39 = vadd.f32 %v1457_v5, %v3526_v28  ;;  %1661 = vst.msk [vmem:[%s4658_s7 + $0x50] sm:$0xff] %vm1650_vm6, %v3090_v3  ;;  %1662 = vst.msk [vmem:[%s4658_s7 + $0x58] sm:$0xff] %vm1650_vm6, %v3090_v3  ;;  %v1587_v0 = vadd.f32 %v1586_v10, %v3662_v14  ;;  %v1530_v10 = vmul.f32 %v3520_v25, %v3520_v25 }
 0x25e   : > { %1663 = vst.msk [vmem:[%s4658_s7 + $0x60] sm:$0xff] %vm1650_vm6, %v3090_v3  ;;  %1664 = vst.msk [vmem:[%s4658_s7 + $0x68] sm:$0xff] %vm1650_vm6, %v3090_v3 }
 0x25f   : > { %1665 = vst.msk [vmem:[%s4658_s7 + $0x70] sm:$0xff] %vm1650_vm6, %v3090_v3  ;;  %1666 = vst.msk [vmem:[%s4658_s7 + $0x78] sm:$0xff] %vm1650_vm6, %v3090_v3  ;;  %v1459_v1 = vadd.f32 %v3658_v39, %v3530_v30  ;;  %v1588_v5 = vadd.f32 %v1587_v0, %v1525_v7  ;;  %v1528_v39 = vmul.f32 %v3522_v26, %v3522_v26 }
 0x260   : > { %1667 = vst.msk [vmem:[%s4658_s7 + $0x80] sm:$0xff] %vm1650_vm6, %v3090_v3  ;;  %1668 = vst.msk [vmem:[%s4658_s7 + $0x88] sm:$0xff] %vm1650_vm6, %v3090_v3  ;;  %v1531_v0 = vmul.f32 %v3526_v28, %v3526_v28 }
 0x261   : > { %1669 = vst.msk [vmem:[%s4658_s7 + $0x90] sm:$0xff] %vm1650_vm6, %v3090_v3  ;;  %1670 = vst.msk [vmem:[%s4658_s7 + $0x98] sm:$0xff] %vm1650_vm6, %v3090_v3  ;;  %v1460_v11 = vadd.f32 %v3524_v27, %v1459_v1 }
 0x262   : > { %1671 = vst.msk [vmem:[%s4658_s7 + $0xa0] sm:$0xff] %vm1650_vm6, %v3090_v3  ;;  %1672 = vst.msk [vmem:[%s4658_s7 + $0xa8] sm:$0xff] %vm1650_vm6, %v3090_v3 }
 0x263   : > { %1673 = vst.msk [vmem:[%s4658_s7 + $0xb0] sm:$0xff] %vm1650_vm6, %v3090_v3  ;;  %1674 = vst.msk [vmem:[%s4658_s7 + $0xb8] sm:$0xff] %vm1650_vm6, %v3090_v3  ;;  %v1461_v2 = vadd.f32 %v3528_v29, %v1460_v11 }
 0x264   : > { %1675 = vst.msk [vmem:[%s4658_s7 + $0xc0] sm:$0xff] %vm1650_vm6, %v3090_v3  ;;  %1676 = vst.msk [vmem:[%s4658_s7 + $0xc8] sm:$0xff] %vm1650_vm6, %v3090_v3 }
 0x265   : > { %1677 = vst.msk [vmem:[%s4658_s7 + $0xd0] sm:$0xff] %vm1650_vm6, %v3090_v3  ;;  %1678 = vst.msk [vmem:[%s4658_s7 + $0xd8] sm:$0xff] %vm1650_vm6, %v3090_v3  ;;  %v1462_v9 = vadd.f32 %v1461_v2, %v3534_v32 }
 0x266   : > { %1679 = vst.msk [vmem:[%s4658_s7 + $0xe0] sm:$0xff] %vm1650_vm6, %v3090_v3  ;;  %1680 = vst.msk [vmem:[%s4658_s7 + $0xe8] sm:$0xff] %vm1650_vm6, %v3090_v3 }
 0x267   : > { %1681 = vst.msk [vmem:[%s4658_s7 + $0xf0] sm:$0xff] %vm1650_vm6, %v3090_v3  ;;  %1682 = vst.msk [vmem:[%s4658_s7 + $0xf8] sm:$0xff] %vm1650_vm6, %v3090_v3  ;;  %v1463_v8 = vadd.f32 %v1462_v9, %v3538_v34 }
 0x268   : > { %1683 = vst.msk [vmem:[%s4658_s7 + $0x100] sm:$0xff] %vm1650_vm6, %v3090_v3  ;;  %1684 = vst.msk [vmem:[%s4658_s7 + $0x108] sm:$0xff] %vm1650_vm6, %v3090_v3 }
 0x269   : > { %1685 = vst.msk [vmem:[%s4658_s7 + $0x110] sm:$0xff] %vm1650_vm6, %v3090_v3  ;;  %1686 = vst.msk [vmem:[%s4658_s7 + $0x118] sm:$0xff] %vm1650_vm6, %v3090_v3  ;;  %v1464_v14 = vadd.f32 %v3532_v31, %v1463_v8 }
 0x26a   : > { %1687 = vst.msk [vmem:[%s4658_s7 + $0x120] sm:$0xff] %vm1650_vm6, %v3090_v3  ;;  %1688 = vst.msk [vmem:[%s4658_s7 + $0x128] sm:$0xff] %vm1650_vm6, %v3090_v3 }
 0x26b   : > { %1689 = vst.msk [vmem:[%s4658_s7 + $0x130] sm:$0xff] %vm1650_vm6, %v3090_v3  ;;  %1690 = vst.msk [vmem:[%s4658_s7 + $0x138] sm:$0xff] %vm1650_vm6, %v3090_v3  ;;  %v1465_v7 = vadd.f32 %v3536_v33, %v1464_v14 }
 0x26c   : > { %1691 = vst.msk [vmem:[%s4658_s7 + $0x140] sm:$0xff] %vm1650_vm6, %v3090_v3  ;;  %1692 = vst.msk [vmem:[%s4658_s7 + $0x148] sm:$0xff] %vm1650_vm6, %v3090_v3 }
 0x26d   : > { %1693 = vst.msk [vmem:[%s4658_s7 + $0x150] sm:$0xff] %vm1650_vm6, %v3090_v3  ;;  %1694 = vst.msk [vmem:[%s4658_s7 + $0x158] sm:$0xff] %vm1650_vm6, %v3090_v3 }
 0x26e   : > { %1695 = vst.msk [vmem:[%s4658_s7 + $0x160] sm:$0xff] %vm1650_vm6, %v3090_v3  ;;  %1696 = vst.msk [vmem:[%s4658_s7 + $0x168] sm:$0xff] %vm1650_vm6, %v3090_v3 }
 0x26f   : > { %1697 = vst.msk [vmem:[%s4658_s7 + $0x170] sm:$0xff] %vm1650_vm6, %v3090_v3  ;;  %1698 = vst.msk [vmem:[%s4658_s7 + $0x178] sm:$0xff] %vm1650_vm6, %v3090_v3 }
 0x270   : > { %1699 = vst.msk [vmem:[%s4658_s7 + $0x180] sm:$0xff] %vm1650_vm6, %v3090_v3  ;;  %1700 = vst.msk [vmem:[%s4658_s7 + $0x188] sm:$0xff] %vm1650_vm6, %v3090_v3 }
 0x271   : > { %1701 = vst.msk [vmem:[%s4658_s7 + $0x190] sm:$0xff] %vm1650_vm6, %v3090_v3  ;;  %1702 = vst.msk [vmem:[%s4658_s7 + $0x198] sm:$0xff] %vm1650_vm6, %v3090_v3 }
 0x272   : > { %1703 = vst.msk [vmem:[%s4658_s7 + $0x1a0] sm:$0xff] %vm1650_vm6, %v3090_v3  ;;  %1704 = vst.msk [vmem:[%s4658_s7 + $0x1a8] sm:$0xff] %vm1650_vm6, %v3090_v3 }
 0x273   : > { %1705 = vst.msk [vmem:[%s4658_s7 + $0x1b0] sm:$0xff] %vm1650_vm6, %v3090_v3  ;;  %1706 = vst.msk [vmem:[%s4658_s7 + $0x1b8] sm:$0xff] %vm1650_vm6, %v3090_v3 }
 0x274   : > { %1707 = vst.msk [vmem:[%s4658_s7 + $0x1c0] sm:$0xff] %vm1650_vm6, %v3090_v3  ;;  %1708 = vst.msk [vmem:[%s4658_s7 + $0x1c8] sm:$0xff] %vm1650_vm6, %v3090_v3 }
 0x275   : > { %1709 = vst.msk [vmem:[%s4658_s7 + $0x1d0] sm:$0xff] %vm1650_vm6, %v3090_v3  ;;  %1710 = vst.msk [vmem:[%s4658_s7 + $0x1d8] sm:$0xff] %vm1650_vm6, %v3090_v3 }
 0x276   : > { %1711 = vst.msk [vmem:[%s4658_s7 + $0x1e0] sm:$0xff] %vm1650_vm6, %v3090_v3  ;;  %1712 = vst.msk [vmem:[%s4658_s7 + $0x1e8] sm:$0xff] %vm1650_vm6, %v3090_v3 }
 0x277   : > { %1713 = vst.msk [vmem:[%s4658_s7 + $0x1f0] sm:$0xff] %vm1650_vm6, %v3090_v3  ;;  %1714 = vst.msk [vmem:[%s4658_s7 + $0x1f8] sm:$0xff] %vm1650_vm6, %v3090_v3  ;;  %v1589_v3 = vadd.f32 %v1588_v5, %v1526_v4  ;;  %v1466_v4 = vadd.f32 %v1465_v7, %v3542_v36  ;;  %v1532_v5 = vmul.f32 %v3530_v30, %v3530_v30 }
 0x279   : > { %v1590_v1 = vadd.f32 %v1589_v3, %v1527_v6  ;;  %v1467_v6 = vadd.f32 %v1466_v4, %v3546_v38  ;;  %v1533_v3 = vmul.f32 %v3524_v27, %v3524_v27 }
 0x27b   : > { %v1591_v11 = vadd.f32 %v1590_v1, %v1528_v39  ;;  %v1468_v39 = vadd.f32 %v3540_v35, %v1467_v6  ;;  %v1534_v1 = vmul.f32 %v3528_v29, %v3528_v29 }
 0x27d   : > { %v1592_v2 = vadd.f32 %v1591_v11, %v1529_v12  ;;  %v1469_v12 = vadd.f32 %v3544_v37, %v1468_v39  ;;  %v1535_v11 = vmul.f32 %v3534_v32, %v3534_v32 }
 0x27f   : > { %v1593_v9 = vadd.f32 %v1592_v2, %v1530_v10  ;;  %v1470_v10 = vadd.f32 %v1469_v12, %v3550_v41  ;;  %v1536_v2 = vmul.f32 %v3538_v34, %v3538_v34  ;;  %v4721_v34 = vld [vmem:[#allocation28_spill] sm:$0xff] }
 0x281   : > { %v1594_v8 = vadd.f32 %v1593_v9, %v1531_v0  ;;  %v1471_v0 = vadd.f32 %v1470_v10, %v3554_v43  ;;  %v1537_v9 = vmul.f32 %v3532_v31, %v3532_v31  ;;  %v4720_v31 = vld [vmem:[#allocation31_spill] sm:$0xff] }
 0x283   : > { %v1595_v14 = vadd.f32 %v1594_v8, %v1532_v5  ;;  %v1472_v5 = vadd.f32 %v3548_v40, %v1471_v0  ;;  %v1538_v8 = vmul.f32 %v3536_v33, %v3536_v33  ;;  %v4719_v33 = vld [vmem:[#allocation29_spill] sm:$0xff] }
 0x285   : > { %v1596_v7 = vadd.f32 %v1595_v14, %v1533_v3  ;;  %v1473_v3 = vadd.f32 %v3552_v42, %v1472_v5  ;;  %v1539_v14 = vmul.f32 %v3542_v36, %v3542_v36  ;;  %v4718_v36 = vld [vmem:[#allocation26_spill] sm:$0xff] }
 0x287   : > { %v1597_v4 = vadd.f32 %v1596_v7, %v1534_v1  ;;  %v1474_v1 = vadd.f32 %v1473_v3, %v3558_v45  ;;  %v1540_v7 = vmul.f32 %v3546_v38, %v3546_v38  ;;  %v4717_v38 = vld [vmem:[#allocation24_spill] sm:$0xff] }
 0x289   : > { %v1598_v6 = vadd.f32 %v1597_v4, %v1535_v11  ;;  %v1475_v11 = vadd.f32 %v1474_v1, %v3562_v47  ;;  %v1541_v4 = vmul.f32 %v3540_v35, %v3540_v35  ;;  %v4716_v35 = vld [vmem:[#allocation27_spill] sm:$0xff] }
 0x28b   : > { %v1599_v39 = vadd.f32 %v1598_v6, %v1536_v2  ;;  %v1476_v2 = vadd.f32 %v3556_v44, %v1475_v11  ;;  %v1542_v6 = vmul.f32 %v3544_v37, %v3544_v37  ;;  %v4715_v37 = vld [vmem:[#allocation25_spill] sm:$0xff] }
 0x28d   : > { %v1600_v12 = vadd.f32 %v1599_v39, %v1537_v9  ;;  %v1477_v9 = vadd.f32 %v3560_v46, %v1476_v2  ;;  %v1543_v39 = vmul.f32 %v3550_v41, %v3550_v41  ;;  %v4714_v41 = vld [vmem:[#allocation22_spill] sm:$0xff] }
 0x28f   : > { %v1601_v10 = vadd.f32 %v1600_v12, %v1538_v8  ;;  %v1478_v8 = vadd.f32 %v1477_v9, %v3566_v49  ;;  %v1544_v12 = vmul.f32 %v3554_v43, %v3554_v43  ;;  %v4713_v43 = vld [vmem:[#allocation20_spill] sm:$0xff] }
 0x291   : > { %v1602_v0 = vadd.f32 %v1601_v10, %v1539_v14  ;;  %v1479_v14 = vadd.f32 %v1478_v8, %v3570_v51  ;;  %v1545_v10 = vmul.f32 %v3548_v40, %v3548_v40  ;;  %v4712_v40 = vld [vmem:[#allocation23_spill] sm:$0xff] }
 0x293   : > { %v1603_v5 = vadd.f32 %v1602_v0, %v1540_v7  ;;  %v1480_v7 = vadd.f32 %v3564_v48, %v1479_v14  ;;  %v1546_v0 = vmul.f32 %v3552_v42, %v3552_v42  ;;  %v4711_v42 = vld [vmem:[#allocation21_spill] sm:$0xff] }
 0x295   : > { %v1604_v3 = vadd.f32 %v1603_v5, %v1541_v4  ;;  %v1481_v4 = vadd.f32 %v3568_v50, %v1480_v7  ;;  %v1547_v5 = vmul.f32 %v3558_v45, %v3558_v45 }
 0x297   : > { %v1605_v1 = vadd.f32 %v1604_v3, %v1542_v6  ;;  %v1482_v6 = vadd.f32 %v1481_v4, %v3574_v53  ;;  %v1548_v3 = vmul.f32 %v3562_v47, %v3562_v47 }
 0x299   : > { %v1606_v11 = vadd.f32 %v1605_v1, %v1543_v39  ;;  %v1483_v39 = vadd.f32 %v1482_v6, %v3578_v55  ;;  %v1549_v1 = vmul.f32 %v3556_v44, %v3556_v44 }
 0x29b   : > { %v1607_v2 = vadd.f32 %v1606_v11, %v1544_v12  ;;  %v1484_v12 = vadd.f32 %v3572_v52, %v1483_v39  ;;  %v1550_v11 = vmul.f32 %v3560_v46, %v3560_v46 }
 0x29d   : > { %v1608_v9 = vadd.f32 %v1607_v2, %v1545_v10  ;;  %v1485_v10 = vadd.f32 %v3576_v54, %v1484_v12  ;;  %v1551_v2 = vmul.f32 %v3566_v49, %v3566_v49 }
 0x29f   : > { %v1609_v8 = vadd.f32 %v1608_v9, %v1546_v0  ;;  %v1486_v0 = vadd.f32 %v1485_v10, %v3582_v57  ;;  %v1552_v9 = vmul.f32 %v3570_v51, %v3570_v51 }
 0x2a1   : > { %v1610_v14 = vadd.f32 %v1609_v8, %v1547_v5  ;;  %v1487_v5 = vadd.f32 %v1486_v0, %v3586_v59  ;;  %v1553_v8 = vmul.f32 %v3564_v48, %v3564_v48 }
 0x2a3   : > { %v1611_v7 = vadd.f32 %v1610_v14, %v1548_v3  ;;  %v1488_v3 = vadd.f32 %v3580_v56, %v1487_v5  ;;  %v1554_v14 = vmul.f32 %v3568_v50, %v3568_v50 }
 0x2a5   : > { %v1612_v4 = vadd.f32 %v1611_v7, %v1549_v1  ;;  %v1489_v1 = vadd.f32 %v3584_v58, %v1488_v3  ;;  %v1555_v7 = vmul.f32 %v3574_v53, %v3574_v53 }
 0x2a7   : > { %v1613_v6 = vadd.f32 %v1612_v4, %v1550_v11  ;;  %v1490_v11 = vadd.f32 %v1489_v1, %v3590_v61  ;;  %v1556_v4 = vmul.f32 %v3578_v55, %v3578_v55 }
 0x2a9   : > { %v1614_v39 = vadd.f32 %v1613_v6, %v1551_v2  ;;  %v1491_v2 = vadd.f32 %v1490_v11, %v3594_v63  ;;  %v1557_v6 = vmul.f32 %v3572_v52, %v3572_v52 }
 0x2ab   : > { %v1615_v12 = vadd.f32 %v1614_v39, %v1552_v9  ;;  %v1492_v9 = vadd.f32 %v3588_v60, %v1491_v2  ;;  %v1558_v39 = vmul.f32 %v3576_v54, %v3576_v54 }
 0x2ad   : > { %v1616_v10 = vadd.f32 %v1615_v12, %v1553_v8  ;;  %v1493_v8 = vadd.f32 %v3592_v62, %v1492_v9  ;;  %v1559_v12 = vmul.f32 %v3582_v57, %v3582_v57 }
 0x2af   : > { %v1617_v0 = vadd.f32 %v1616_v10, %v1554_v14  ;;  %v1494_v14 = vadd.f32 %v1493_v8, %v4711_v42  ;;  %v1560_v10 = vmul.f32 %v3586_v59, %v3586_v59 }
 0x2b1   : > { %v1618_v5 = vadd.f32 %v1617_v0, %v1555_v7  ;;  %v1495_v7 = vadd.f32 %v1494_v14, %v4712_v40  ;;  %v1561_v0 = vmul.f32 %v3580_v56, %v3580_v56 }
 0x2b3   : > { %v1619_v3 = vadd.f32 %v1618_v5, %v1556_v4  ;;  %v1496_v4 = vadd.f32 %v4713_v43, %v1495_v7  ;;  %v1562_v5 = vmul.f32 %v3584_v58, %v3584_v58 }
 0x2b5   : > { %v1620_v1 = vadd.f32 %v1619_v3, %v1557_v6  ;;  %v1497_v6 = vadd.f32 %v4714_v41, %v1496_v4  ;;  %v1563_v3 = vmul.f32 %v3590_v61, %v3590_v61 }
 0x2b7   : > { %v1621_v11 = vadd.f32 %v1620_v1, %v1558_v39  ;;  %v1498_v39 = vadd.f32 %v1497_v6, %v4715_v37  ;;  %v1564_v1 = vmul.f32 %v3594_v63, %v3594_v63 }
 0x2b9   : > { %v1622_v2 = vadd.f32 %v1621_v11, %v1559_v12  ;;  %v1499_v12 = vadd.f32 %v1498_v39, %v4716_v35  ;;  %v1565_v11 = vmul.f32 %v3588_v60, %v3588_v60 }
 0x2bb   : > { %v1623_v9 = vadd.f32 %v1622_v2, %v1560_v10  ;;  %v1500_v10 = vadd.f32 %v4717_v38, %v1499_v12  ;;  %v1566_v2 = vmul.f32 %v3592_v62, %v3592_v62 }
 0x2bd   : > { %v1624_v8 = vadd.f32 %v1623_v9, %v1561_v0  ;;  %v1501_v0 = vadd.f32 %v4718_v36, %v1500_v10  ;;  %v1567_v9 = vmul.f32 %v4711_v42, %v4711_v42  ;;  %v4722_v42 = vld [vmem:[#allocation30_spill] sm:$0xff] }
 0x2bf   : > { %v1625_v14 = vadd.f32 %v1624_v8, %v1562_v5  ;;  %v1502_v5 = vadd.f32 %v1501_v0, %v4719_v33  ;;  %v1568_v8 = vmul.f32 %v4712_v40, %v4712_v40 }
 0x2c1   : > { %v1626_v7 = vadd.f32 %v1625_v14, %v1563_v3  ;;  %v1503_v3 = vadd.f32 %v1502_v5, %v4720_v31  ;;  %v1569_v14 = vmul.f32 %v4713_v43, %v4713_v43  ;;  %v1573_v43 = vmul.f32 %v4717_v38, %v4717_v38 }
 0x2c2   : > { %v1577_v38 = vmul.f32 %v4721_v34, %v4721_v34 }
 0x2c3   : > { %v1627_v4 = vadd.f32 %v1626_v7, %v1564_v1  ;;  %v1504_v1 = vadd.f32 %v4721_v34, %v1503_v3  ;;  %v1570_v7 = vmul.f32 %v4714_v41, %v4714_v41  ;;  %v1574_v41 = vmul.f32 %v4718_v36, %v4718_v36 }
 0x2c4   : > { %v1578_v36 = vmul.f32 %v4722_v42, %v4722_v42 }
 0x2c5   : > { %v1628_v6 = vadd.f32 %v1627_v4, %v1565_v11  ;;  %v1505_v11 = vadd.f32 %v4722_v42, %v1504_v1  ;;  %v1571_v4 = vmul.f32 %v4715_v37, %v4715_v37  ;;  %v1575_v37 = vmul.f32 %v4719_v33, %v4719_v33 }
 0x2c7   : > { %v1629_v39 = vadd.f32 %v1628_v6, %v1566_v2  ;;  %v1506_v40 = vrot.slane %v1505_v11, 4  ;;  %v1572_v2 = vmul.f32 %v4716_v35, %v4716_v35  ;;  %v1576_v35 = vmul.f32 %v4720_v31, %v4720_v31 }
 0x2c9   : > { %v1630_v12 = vadd.f32 %v1629_v39, %v1567_v9  ;;  %v1507_v5 = vadd.f32 %v1506_v40, %v1505_v11 }
 0x2cb   : > { %v1631_v10 = vadd.f32 %v1630_v12, %v1568_v8  ;;  %v1508_v39 = vrot.slane %v1507_v5, 2 }
 0x2cd   : > { %v1632_v0 = vadd.f32 %v1631_v10, %v1569_v14  ;;  %v1509_v3 = vadd.f32 %v1508_v39, %v1507_v5 }
 0x2cf   : > { %v1633_v6 = vadd.f32 %v1632_v0, %v1570_v7  ;;  %v1510_v12 = vrot.slane %v1509_v3, 1  ;;  %v1442_v7 = vld [vmem:[#allocation2] sm:$0x1] }
 0x2d1   : > { %v1634_v9 = vadd.f32 %v1633_v6, %v1571_v4  ;;  %v1511_v10 = vadd.f32 %v1510_v12, %v1509_v3 }
 0x2d3   : > { %v1635_v8 = vadd.f32 %v1634_v9, %v1572_v2  ;;  %v1512_v4 = vadd.f32 %v1511_v10, %v1442_v7  ;;  %v1514_v9 = vld [vmem:[#allocation3] sm:$0x1] }
 0x2d5   : > { %v1636_v14 = vadd.f32 %v1635_v8, %v1573_v43  ;;  %1513 = vst [vmem:[#allocation2] sm:$0x1] %v1512_v4 }
 0x2d7   : > { %v1637_v1 = vadd.f32 %v1636_v14, %v1574_v41 }
 0x2d9   : > { %v1638_v11 = vadd.f32 %v1637_v1, %v1575_v37 }
 0x2db   : > { %v1639_v0 = vadd.f32 %v1638_v11, %v1576_v35 }
 0x2dd   : > { %v1640_v40 = vadd.f32 %v1639_v0, %v1577_v38 }
 0x2df   : > { %v1641_v33 = vadd.f32 %v1640_v40, %v1578_v36 }
 0x2e1   : > { %v1642_v2 = vrot.slane %v1641_v33, 4 }
 0x2e3   : > { %v1643_v6 = vadd.f32 %v1642_v2, %v1641_v33 }
 0x2e5   : > { %v1644_v5 = vrot.slane %v1643_v6, 2 }
 0x2e7   : > { %v1645_v43 = vadd.f32 %v1644_v5, %v1643_v6 }
 0x2e9   : > { %v1646_v31 = vrot.slane %v1645_v43, 1 }
 0x2eb   : > { %v1647_v39 = vadd.f32 %v1646_v31, %v1645_v43 }
 0x2ed   : > { %v1648_v41 = vadd.f32 %v1647_v39, %v1514_v9 }
 0x2ef   : > { %1649 = vst [vmem:[#allocation3] sm:$0x1] %v1648_v41 }
 0x2f0 PF: > { %p1715_p6 = scmp.eq.s32.totalorder %s3079_s24, 1 }
 0x2f1   : > { %v1720_v34 = vld [vmem:[#allocation2] sm:$0x1] (%p1715_p6) }
 0x2f2   : > { %1719 = sbr.rel (!%p1715_p6) target bundleno = 785 (0x311), region = 60  ;;  %v1721_v42 = vmul.f32 (%p1715_p6), 0.001953125, %v1720_v34  ;;  %v1727_v1 = vld [vmem:[%s4655_s4] sm:$0x1] (%p1715_p6) }
 0x2f3   : > { %v1732_v38 = vld [vmem:[%s4656_s5] sm:$0x1] (%p1715_p6) }
 0x2f4   : > { %v1724_v37 = vmul.f32 (%p1715_p6), %v1721_v42, %v1721_v42 }
 0x2f6   : > { %v1722_v8 = vld [vmem:[#allocation3] sm:$0x1] (%p1715_p6) }
 0x2f7   : > { %v1723_v3 = vmul.f32 (%p1715_p6), 0.001953125, %v1722_v8 }
 0x2f9   : > { %v1725_v14 = vsub.f32 %v1723_v3, %v1724_v37 }
 0x2fb   : > { %v1726_v12 = vmax.f32 %v1725_v14, 0.0 }
 0x2fd   : > { %v1728_v35 = vadd.f32 1e-05, %v1726_v12 }
 0x2ff   : > { %3055 = vrsqrt.f32 %v1728_v35 }
 0x309   : > { %v3056_v7 = vpop.eup %3055 }
 0x30a   : > { %v1730_v10 = vmul.f32 %v3056_v7, %v1727_v1 }
 0x30c   : > { %1731 = vst [vmem:[#allocation4] sm:$0x1] %v1730_v10  ;;  %v1733_v11 = vmul.f32 %v1730_v10, %v1721_v42 }
 0x30e   : > { %v1734_v4 = vsub.f32 %v1732_v38, %v1733_v11 }
 0x310   : > { %1735 = vst [vmem:[#allocation5] sm:$0x1] %v1734_v4 }
 0x311 PF: > { %p2664_p7 = scmp.ne.s32.totalorder %s3079_s24, 1 }
 0x312   : > { %v3057_v36 = vld [vmem:[%s4657_s6] sm:$0xff] (!%p2664_p7)   ;;  %v3058_v0 = vld [vmem:[%s4657_s6 + $0x8] sm:$0xff] (!%p2664_p7)   ;;  %v3059_v40 = vld [vmem:[%s4657_s6 + $0x10] sm:$0xff] (!%p2664_p7)  }
 0x313   : > { %1738 = sbr.rel (%p2664_p7) target bundleno = 1100 (0x44c), region = 64  ;;  %2928 = vmatprep.subr.bf16.mxu0 (!%p2664_p7), %v3057_v36  ;;  %3008 = vmatprep.subr.bf16.mxu1 (!%p2664_p7), %v3057_v36  ;;  %v3060_v33 = vld [vmem:[%s4657_s6 + $0x18] sm:$0xff] (!%p2664_p7)   ;;  %v4165_v2 = vld [vmem:[#allocation4] ss:$0 sm:$0xff] (!%p2664_p7)  ;;  %v4723_v5 = vld [vmem:[#allocation7_spill] sm:$0xff] (!%p2664_p7) }
 0x314   : > { %2929 = vmatpush3.bf16.msra.mxu0 (!%p2664_p7), %v3057_v36  ;;  %3016 = vmatpush3.bf16.msra.mxu1 (!%p2664_p7), %v3057_v36  ;;  %v1746_v43 = vmul.f32 (!%p2664_p7), %v4165_v2, %v4723_v5  ;;  %v4724_v31 = vld [vmem:[#allocation8_spill] sm:$0xff] (!%p2664_p7)  ;;  %v1778_v39 = vmul.f32 (!%p2664_p7), %v4165_v2, %v3558_v45  ;;  %v1779_v41 = vmul.f32 (!%p2664_p7), %v4165_v2, %v3562_v47  ;;  %v4725_v34 = vld [vmem:[#allocation6_spill] sm:$0xff] (!%p2664_p7) }
 0x315   : > { %2930 = vmatprep.subr.bf16.mxu0 (!%p2664_p7), %v3058_v0  ;;  %3009 = vmatprep.subr.bf16.mxu1 (!%p2664_p7), %v3058_v0  ;;  %v1747_v9 = vmul.f32 (!%p2664_p7), %v4165_v2, %v4724_v31  ;;  %v1748_v8 = vmul.f32 (!%p2664_p7), %v4725_v34, %v4165_v2  ;;  %v1749_v42 = vmul.f32 (!%p2664_p7), %v3496_v13, %v4165_v2  ;;  %v3061_v13 = vld [vmem:[%s4657_s6 + $0x20] sm:$0xff] (!%p2664_p7)   ;;  %v3062_v4 = vld [vmem:[%s4657_s6 + $0x28] sm:$0xff] (!%p2664_p7)  }
 0x316   : > { %v1780_v3 = vmul.f32 (!%p2664_p7), %v3556_v44, %v4165_v2  ;;  %v1781_v37 = vmul.f32 (!%p2664_p7), %v3560_v46, %v4165_v2  ;;  %v1751_v34 = vmul.f32 (!%p2664_p7), %v4165_v2, %v3506_v18 }
 0x317   : > { %v4167_v6 = vld [vmem:[#allocation5] ss:$0 sm:$0xff] (!%p2664_p7) }
 0x318   : > { %2931 = vmatpush3.bf16.msra.mxu0 (!%p2664_p7), %v3058_v0  ;;  %3017 = vmatpush3.bf16.msra.mxu1 (!%p2664_p7), %v3058_v0  ;;  %v1817_v14 = vadd.f32 (!%p2664_p7), %v4167_v6, %v1746_v43  ;;  %v1818_v45 = vadd.f32 (!%p2664_p7), %v4167_v6, %v1747_v9  ;;  %v1849_v47 = vadd.f32 (!%p2664_p7), %v4167_v6, %v1778_v39 }
 0x319   : > { %2932 = vmatprep.subr.bf16.mxu0 (!%p2664_p7), %v3059_v40  ;;  %3010 = vmatprep.subr.bf16.mxu1 (!%p2664_p7), %v3059_v40  ;;  %v1850_v12 = vadd.f32 (!%p2664_p7), %v4167_v6, %v1779_v41  ;;  %v1819_v44 = vadd.f32 (!%p2664_p7), %v4167_v6, %v1748_v8  ;;  %v1820_v46 = vadd.f32 (!%p2664_p7), %v4167_v6, %v1749_v42 }
 0x31a   : > { %vm1881_vm7 = vcmp.ge.f32.partialorder %v1817_v14, 0.0  ;;  %vm1882_vm8 = vcmp.ge.f32.partialorder %v1818_v45, 0.0  ;;  %v1945_v35 = vmul.f32 0.2, %v1817_v14  ;;  %v1946_v1 = vmul.f32 0.2, %v1818_v45 }
 0x31b   : > { %vm1913_vm9 = vcmp.ge.f32.partialorder %v1849_v47, 0.0  ;;  %vm1914_vm10 = vcmp.ge.f32.partialorder %v1850_v12, 0.0  ;;  %v1977_v7 = vmul.f32 0.2, %v1849_v47  ;;  %v1978_v10 = vmul.f32 0.2, %v1850_v12 }
 0x31c   : > { %2933 = vmatpush3.bf16.msra.mxu0 %v3059_v40  ;;  %3018 = vmatpush3.bf16.msra.mxu1 %v3059_v40  ;;  %v2009_v38 = vsel %vm1881_vm7, %v1817_v14, %v1945_v35  ;;  %v2010_v11 = vsel %vm1882_vm8, %v1818_v45, %v1946_v1  ;;  %vm1883_vm11 = vcmp.ge.f32.partialorder %v1819_v44, 0.0  ;;  %vm1884_vm12 = vcmp.ge.f32.partialorder %v1820_v46, 0.0 }
 0x31d   : > { %2934 = vmatprep.subr.bf16.mxu0 %v3060_v33  ;;  %3011 = vmatprep.subr.bf16.mxu1 %v3060_v33  ;;  %v2073_v36 = vpack.c.bf16 %v2010_v11, %v2009_v38  ;;  %v2041_v0 = vsel %vm1913_vm9, %v1849_v47, %v1977_v7  ;;  %v2042_v40 = vsel %vm1914_vm10, %v1850_v12, %v1978_v10  ;;  %v1947_v5 = vmul.f32 0.2, %v1819_v44 }
 0x31e   : > { %v2089_v43 = vpack.c.bf16 %v2042_v40, %v2041_v0  ;;  %v1948_v31 = vmul.f32 0.2, %v1820_v46  ;;  %v1851_v9 = vadd.f32 %v4167_v6, %v1780_v3  ;;  %v1750_v41 = vmul.f32 %v4165_v2, %v3502_v16  ;;  %v3063_v16 = vld [vmem:[%s4657_s6 + $0x30] sm:$0xff]  }
 0x31f   : > { %2944 = vmatprep.mubr.bf16.mxu0 %v2073_v36  ;;  %v4199_v39 = vsel %vm1883_vm11, %v1819_v44, %v1947_v5  ;;  %v1782_v8 = vmul.f32 %v4165_v2, %v3566_v49  ;;  %v1822_v14 = vadd.f32 %v4167_v6, %v1751_v34  ;;  %v1783_v47 = vmul.f32 %v4165_v2, %v3570_v51  ;;  %v3064_v51 = vld [vmem:[%s4657_s6 + $0x38] sm:$0xff]  }
 0x320   : > { %2935 = vmatpush3.bf16.msra.mxu0 %v3060_v33  ;;  %3019 = vmatpush3.bf16.msra.mxu1 %v3060_v33  ;;  %v1852_v33 = vadd.f32 %v4167_v6, %v1781_v37  ;;  %v4208_v42 = vsel %vm1884_vm12, %v1820_v46, %v1948_v31  ;;  %vm1915_vm13 = vcmp.ge.f32.partialorder %v1851_v9, 0.0  ;;  %v1979_v3 = vmul.f32 0.2, %v1851_v9 }
 0x321   : > { %2936 = vmatprep.subr.bf16.mxu0 %v3061_v13  ;;  %3012 = vmatprep.subr.bf16.mxu1 %v3061_v13  ;;  %v2074_v18 = vpack.c.bf16 %v4208_v42, %v4199_v39  ;;  %v1821_v49 = vadd.f32 %v4167_v6, %v1750_v41  ;;  %v1752_v12 = vmul.f32 %v3500_v15, %v4165_v2  ;;  %vm1886_vm0 = vcmp.ge.f32.partialorder %v1822_v14, 0.0 }
 0x322   : > { %vm1916_vm14 = vcmp.ge.f32.partialorder %v1852_v33, 0.0  ;;  %v1980_v37 = vmul.f32 0.2, %v1852_v33  ;;  %2976 = vmatprep.mubr.bf16.mxu1 %v2089_v43  ;;  %v4217_v45 = vsel %vm1915_vm13, %v1851_v9, %v1979_v3  ;;  %v1950_v1 = vmul.f32 0.2, %v1822_v14 }
 0x323   : > { %vm1885_vm15 = vcmp.ge.f32.partialorder %v1821_v49, 0.0  ;;  %v1949_v46 = vmul.f32 0.2, %v1821_v49  ;;  %v1854_v7 = vadd.f32 %v4167_v6, %v1783_v47  ;;  %v1753_v38 = vmul.f32 %v3504_v17, %v4165_v2 }
 0x324   : > { %2937 = vmatpush3.bf16.msra.mxu0 %v3061_v13  ;;  %3020 = vmatpush3.bf16.msra.mxu1 %v3061_v13  ;;  %v1853_v13 = vadd.f32 %v4167_v6, %v1782_v8  ;;  %v2044_v44 = vsel %vm1916_vm14, %v1852_v33, %v1980_v37  ;;  %v1823_v11 = vadd.f32 %v4167_v6, %v1752_v12 }
 0x325   : > { %2938 = vmatprep.subr.bf16.mxu0 %v3062_v4  ;;  %3013 = vmatprep.subr.bf16.mxu1 %v3062_v4  ;;  %v2090_v35 = vpack.c.bf16 %v2044_v44, %v4217_v45  ;;  %v2013_v10 = vsel %vm1885_vm15, %v1821_v49, %v1949_v46  ;;  %vm1918_vm2 = vcmp.ge.f32.partialorder %v1854_v7, 0.0  ;;  %v1982_v36 = vmul.f32 0.2, %v1854_v7 }
 0x326   : > { %vm1917_vm1 = vcmp.ge.f32.partialorder %v1853_v13, 0.0  ;;  %v1981_v15 = vmul.f32 0.2, %v1853_v13  ;;  %v1784_v0 = vmul.f32 %v3564_v48, %v4165_v2  ;;  %v1824_v43 = vadd.f32 %v4167_v6, %v1753_v38 }
 0x327   : > { %vm1887_vm3 = vcmp.ge.f32.partialorder %v1823_v11, 0.0  ;;  %v2046_v31 = vsel %vm1918_vm2, %v1854_v7, %v1982_v36  ;;  %v1951_v9 = vmul.f32 0.2, %v1823_v11  ;;  %v1785_v17 = vmul.f32 %v3568_v50, %v4165_v2 }
 0x328   : > { %2939 = vmatpush3.bf16.msra.mxu0 %v3062_v4  ;;  %3021 = vmatpush3.bf16.msra.mxu1 %v3062_v4  ;;  %v2014_v4 = vsel %vm1886_vm0, %v1822_v14, %v1950_v1  ;;  %v2045_v5 = vsel %vm1917_vm1, %v1853_v13, %v1981_v15  ;;  %v1855_v33 = vadd.f32 %v4167_v6, %v1784_v0  ;;  %vm1888_vm4 = vcmp.ge.f32.partialorder %v1824_v43, 0.0 }
 0x329   : > { %2940 = vmatprep.subr.bf16.mxu0 %v3063_v16  ;;  %3014 = vmatprep.subr.bf16.mxu1 %v3063_v16  ;;  %v2075_v40 = vpack.c.bf16 %v2014_v4, %v2013_v10  ;;  %v2091_v41 = vpack.c.bf16 %v2046_v31, %v2045_v5  ;;  %v1952_v34 = vmul.f32 0.2, %v1824_v43  ;;  %v1754_v48 = vmul.f32 %v4165_v2, %v3510_v20 }
 0x32a   : > { %v2015_v8 = vsel %vm1887_vm3, %v1823_v11, %v1951_v9  ;;  %v1856_v3 = vadd.f32 %v4167_v6, %v1785_v17  ;;  %vm1919_vm5 = vcmp.ge.f32.partialorder %v1855_v33, 0.0  ;;  %v1755_v49 = vmul.f32 %v4165_v2, %v3514_v22 }
 0x32b   : > { %v2016_v37 = vsel %vm1888_vm4, %v1824_v43, %v1952_v34  ;;  %v1825_v50 = vadd.f32 %v4167_v6, %v1754_v48  ;;  %v1786_v14 = vmul.f32 %v4165_v2, %v3574_v53  ;;  %v1787_v44 = vmul.f32 %v4165_v2, %v3578_v55 }
 0x32c   : > { %2941 = vmatpush3.bf16.msra.mxu0 %v3063_v16  ;;  %3022 = vmatpush3.bf16.msra.mxu1 %v3063_v16  ;;  %v1983_v16 = vmul.f32 0.2, %v1855_v33  ;;  %v2076_v45 = vpack.c.bf16 %v2016_v37, %v2015_v8  ;;  %vm1920_vm6 = vcmp.ge.f32.partialorder %v1856_v3, 0.0  ;;  %v1984_v47 = vmul.f32 0.2, %v1856_v3 }
 0x32d   : > { %2942 = vmatprep.subr.bf16.mxu0 %v3064_v51  ;;  %3015 = vmatprep.subr.bf16.mxu1 %v3064_v51  ;;  %v1826_v13 = vadd.f32 %v4167_v6, %v1755_v49  ;;  %vm1889_vm7 = vcmp.ge.f32.partialorder %v1825_v50, 0.0  ;;  %v1953_v12 = vmul.f32 0.2, %v1825_v50  ;;  %v1857_v22 = vadd.f32 %v4167_v6, %v1786_v14 }
 0x32e   : > { %v2047_v20 = vsel %vm1919_vm5, %v1855_v33, %v1983_v16  ;;  %v2048_v46 = vsel %vm1920_vm6, %v1856_v3, %v1984_v47  ;;  %v1756_v1 = vmul.f32 %v3508_v19, %v4165_v2  ;;  %v1757_v53 = vmul.f32 %v3512_v21, %v4165_v2 }
 0x32f   : > { %v2092_v7 = vpack.c.bf16 %v2048_v46, %v2047_v20  ;;  %vm1890_vm8 = vcmp.ge.f32.partialorder %v1826_v13, 0.0  ;;  %v2017_v10 = vsel %vm1889_vm7, %v1825_v50, %v1953_v12  ;;  %v1858_v55 = vadd.f32 %v4167_v6, %v1787_v44 }
 0x330   : > { %2943 = vmatpush3.bf16.msra.mxu0 %v3064_v51  ;;  %3023 = vmatpush3.bf16.msra.mxu1 %v3064_v51  ;;  %v1954_v51 = vmul.f32 0.2, %v1826_v13  ;;  %vm1921_vm9 = vcmp.ge.f32.partialorder %v1857_v22, 0.0  ;;  %v1985_v15 = vmul.f32 0.2, %v1857_v22  ;;  %v1827_v19 = vadd.f32 %v4167_v6, %v1756_v1 }
 0x331   : > { %v1828_v21 = vadd.f32 %v4167_v6, %v1757_v53  ;;  %v1788_v39 = vmul.f32 %v3572_v52, %v4165_v2  ;;  %v1789_v42 = vmul.f32 %v3576_v54, %v4165_v2  ;;  %vm1922_vm10 = vcmp.ge.f32.partialorder %v1858_v55, 0.0 }
 0x332   : > { %v2018_v38 = vsel %vm1890_vm8, %v1826_v13, %v1954_v51  ;;  %v2049_v11 = vsel %vm1921_vm9, %v1857_v22, %v1985_v15  ;;  %vm1891_vm11 = vcmp.ge.f32.partialorder %v1827_v19, 0.0  ;;  %v1955_v4 = vmul.f32 0.2, %v1827_v19 }
 0x333   : > { %2945 = vmatmul.mubr.bf16.vlgmr.msra.gmra.mrb[0].mxu0 %v2074_v18  ;;  %2977 = vmatmul.mubr.bf16.vlgmr.msra.gmra.mrb[0].mxu1 %v2090_v35  ;;  %v2077_v18 = vpack.c.bf16 %v2018_v38, %v2017_v10  ;;  %v1986_v35 = vmul.f32 0.2, %v1858_v55  ;;  %vm1892_vm12 = vcmp.ge.f32.partialorder %v1828_v21, 0.0  ;;  %v1956_v36 = vmul.f32 0.2, %v1828_v21 }
 0x334   : > { %2948 = vmatprep.mubr.bf16.mxu0 %v2075_v40  ;;  %2980 = vmatprep.mubr.bf16.mxu1 %v2091_v41  ;;  %v1859_v40 = vadd.f32 %v4167_v6, %v1788_v39  ;;  %v1860_v5 = vadd.f32 %v4167_v6, %v1789_v42  ;;  %v1758_v43 = vmul.f32 %v4165_v2, %v3518_v24 }
 0x335   : > { %v2050_v0 = vsel %vm1922_vm10, %v1858_v55, %v1986_v35  ;;  %v2019_v31 = vsel %vm1891_vm11, %v1827_v19, %v1955_v4  ;;  %v2020_v9 = vsel %vm1892_vm12, %v1828_v21, %v1956_v36  ;;  %v1759_v54 = vmul.f32 %v4165_v2, %v3522_v26 }
 0x336   : > { %v2093_v52 = vpack.c.bf16 %v2050_v0, %v2049_v11  ;;  %v2078_v17 = vpack.c.bf16 %v2020_v9, %v2019_v31  ;;  %vm1923_vm13 = vcmp.ge.f32.partialorder %v1859_v40, 0.0  ;;  %vm1924_vm14 = vcmp.ge.f32.partialorder %v1860_v5, 0.0 }
 0x337   : > { %v1987_v33 = vmul.f32 0.2, %v1859_v40  ;;  %v1988_v41 = vmul.f32 0.2, %v1860_v5  ;;  %v1829_v34 = vadd.f32 %v4167_v6, %v1758_v43  ;;  %v1830_v48 = vadd.f32 %v4167_v6, %v1759_v54 }
 0x338   : > { %v1790_v24 = vmul.f32 %v4165_v2, %v3582_v57  ;;  %v1791_v26 = vmul.f32 %v4165_v2, %v3586_v59  ;;  %v1760_v3 = vmul.f32 %v3516_v23, %v4165_v2  ;;  %v1761_v47 = vmul.f32 %v3520_v25, %v4165_v2 }
 0x339   : > { %v2051_v8 = vsel %vm1923_vm13, %v1859_v40, %v1987_v33  ;;  %v2052_v16 = vsel %vm1924_vm14, %v1860_v5, %v1988_v41  ;;  %vm1893_vm15 = vcmp.ge.f32.partialorder %v1829_v34, 0.0  ;;  %vm1894_vm0 = vcmp.ge.f32.partialorder %v1830_v48, 0.0 }
 0x33a   : > { %v1957_v37 = vmul.f32 0.2, %v1829_v34  ;;  %v2094_v49 = vpack.c.bf16 %v2052_v16, %v2051_v8  ;;  %v1958_v50 = vmul.f32 0.2, %v1830_v48  ;;  %v1861_v14 = vadd.f32 %v4167_v6, %v1790_v24 }
 0x33b   : > { %2949 = vmatmul.mubr.bf16.gmra.mrb[4].mxu0 %v2076_v45  ;;  %2981 = vmatmul.mubr.bf16.gmra.mrb[4].mxu1 %v2092_v7  ;;  %v1862_v45 = vadd.f32 %v4167_v6, %v1791_v26  ;;  %v1831_v20 = vadd.f32 %v4167_v6, %v1760_v3  ;;  %v1792_v59 = vmul.f32 %v3580_v56, %v4165_v2  ;;  %v4726_v26 = vld [vmem:[#allocation11_spill] sm:$0xff] }
 0x33c   : > { %2952 = vmatprep.mubr.bf16.mxu0 %v2077_v18  ;;  %2984 = vmatprep.mubr.bf16.mxu1 %v2093_v52  ;;  %v2021_v57 = vsel %vm1893_vm15, %v1829_v34, %v1957_v37  ;;  %v2022_v23 = vsel %vm1894_vm0, %v1830_v48, %v1958_v50  ;;  %vm1925_vm1 = vcmp.ge.f32.partialorder %v1861_v14, 0.0  ;;  %v1989_v13 = vmul.f32 0.2, %v1861_v14 }
 0x33d   : > { %vm1926_vm2 = vcmp.ge.f32.partialorder %v1862_v45, 0.0  ;;  %v2079_v12 = vpack.c.bf16 %v2022_v23, %v2021_v57  ;;  %v1990_v44 = vmul.f32 0.2, %v1862_v45  ;;  %v1832_v46 = vadd.f32 %v4167_v6, %v1761_v47  ;;  %v4727_v57 = vld [vmem:[#allocation21_spill] sm:$0xff]  ;;  %v4728_v47 = vld [vmem:[#allocation23_spill] sm:$0xff] }
 0x33e   : > { %vm1895_vm3 = vcmp.ge.f32.partialorder %v1831_v20, 0.0  ;;  %v2053_v22 = vsel %vm1925_vm1, %v1861_v14, %v1989_v13  ;;  %v1959_v1 = vmul.f32 0.2, %v1831_v20  ;;  %v1793_v53 = vmul.f32 %v3584_v58, %v4165_v2 }
 0x33f   : > { %v1863_v25 = vadd.f32 %v4167_v6, %v1792_v59  ;;  %v2054_v7 = vsel %vm1926_vm2, %v1862_v45, %v1990_v44  ;;  %vm1896_vm4 = vcmp.ge.f32.partialorder %v1832_v46, 0.0  ;;  %v1960_v56 = vmul.f32 0.2, %v1832_v46 }
 0x340   : > { %v1762_v51 = vmul.f32 %v4165_v2, %v3526_v28  ;;  %v2095_v10 = vpack.c.bf16 %v2054_v7, %v2053_v22  ;;  %v2023_v55 = vsel %vm1895_vm3, %v1831_v20, %v1959_v1  ;;  %v1864_v15 = vadd.f32 %v4167_v6, %v1793_v53  ;;  %v4729_v53 = vld [vmem:[#allocation9_spill] sm:$0xff] }
 0x341   : > { %vm1927_vm5 = vcmp.ge.f32.partialorder %v1863_v25, 0.0  ;;  %v2024_v19 = vsel %vm1896_vm4, %v1832_v46, %v1960_v56  ;;  %v1991_v38 = vmul.f32 0.2, %v1863_v25  ;;  %v1763_v58 = vmul.f32 %v4165_v2, %v3530_v30 }
 0x342   : > { %v1833_v21 = vadd.f32 %v4167_v6, %v1762_v51  ;;  %v2080_v39 = vpack.c.bf16 %v2024_v19, %v2023_v55  ;;  %vm1928_vm6 = vcmp.ge.f32.partialorder %v1864_v15, 0.0  ;;  %v1992_v42 = vmul.f32 0.2, %v1864_v15 }
 0x343   : > { %2953 = vmatmul.mubr.bf16.gmra.mrb[8].mxu0 %v2078_v17  ;;  %2985 = vmatmul.mubr.bf16.gmra.mrb[8].mxu1 %v2094_v49  ;;  %v1794_v28 = vmul.f32 %v4165_v2, %v3590_v61  ;;  %v2055_v18 = vsel %vm1927_vm5, %v1863_v25, %v1991_v38  ;;  %v1834_v35 = vadd.f32 %v4167_v6, %v1763_v58 }
 0x344   : > { %2956 = vmatprep.mubr.bf16.mxu0 %v2079_v12  ;;  %2988 = vmatprep.mubr.bf16.mxu1 %v2095_v10  ;;  %vm1897_vm7 = vcmp.ge.f32.partialorder %v1833_v21, 0.0  ;;  %v1961_v11 = vmul.f32 0.2, %v1833_v21  ;;  %v2056_v4 = vsel %vm1928_vm6, %v1864_v15, %v1992_v42  ;;  %v1795_v36 = vmul.f32 %v4165_v2, %v3594_v63  ;;  %v4730_v10 = vld [vmem:[#allocation10_spill] sm:$0xff] }
 0x345   : > { %v1865_v30 = vadd.f32 %v4167_v6, %v1794_v28  ;;  %v1764_v0 = vmul.f32 %v3524_v27, %v4165_v2  ;;  %v2096_v40 = vpack.c.bf16 %v2056_v4, %v2055_v18  ;;  %vm1898_vm8 = vcmp.ge.f32.partialorder %v1834_v35, 0.0  ;;  %v4732_v18 = vld [vmem:[#allocation22_spill] sm:$0xff] }
 0x346   : > { %v1962_v5 = vmul.f32 0.2, %v1834_v35  ;;  %v2025_v43 = vsel %vm1897_vm7, %v1833_v21, %v1961_v11  ;;  %v1866_v61 = vadd.f32 %v4167_v6, %v1795_v36  ;;  %v1765_v31 = vmul.f32 %v3528_v29, %v4165_v2  ;;  %v4733_v11 = vld [vmem:[#allocation13_spill] sm:$0xff]  ;;  %v4734_v36 = vld [vmem:[#allocation15_spill] sm:$0xff] }
 0x347   : > { %vm1929_vm9 = vcmp.ge.f32.partialorder %v1865_v30, 0.0  ;;  %v1993_v52 = vmul.f32 0.2, %v1865_v30  ;;  %v1835_v63 = vadd.f32 %v4167_v6, %v1764_v0  ;;  %v1796_v54 = vmul.f32 %v3588_v60, %v4165_v2 }
 0x348   : > { %v2026_v9 = vsel %vm1898_vm8, %v1834_v35, %v1962_v5  ;;  %vm1930_vm10 = vcmp.ge.f32.partialorder %v1866_v61, 0.0  ;;  %v1994_v17 = vmul.f32 0.2, %v1866_v61  ;;  %v1836_v41 = vadd.f32 %v4167_v6, %v1765_v31 }
 0x349   : > { %v2081_v27 = vpack.c.bf16 %v2026_v9, %v2025_v43  ;;  %v2057_v33 = vsel %vm1929_vm9, %v1865_v30, %v1993_v52  ;;  %vm1899_vm11 = vcmp.ge.f32.partialorder %v1835_v63, 0.0  ;;  %v1963_v34 = vmul.f32 0.2, %v1835_v63 }
 0x34a   : > { %v1797_v48 = vmul.f32 %v3592_v62, %v4165_v2  ;;  %v2058_v29 = vsel %vm1930_vm10, %v1866_v61, %v1994_v17  ;;  %v1867_v24 = vadd.f32 %v4167_v6, %v1796_v54  ;;  %v1766_v8 = vmul.f32 %v4165_v2, %v3534_v32  ;;  %v4735_v54 = vld [vmem:[#allocation25_spill] sm:$0xff] }
 0x34b   : > { %2957 = vmatmul.mubr.bf16.gmra.mrb[12].mxu0 %v2080_v39  ;;  %2989 = vmatmul.mubr.bf16.gmra.mrb[12].mxu1 %v2096_v40  ;;  %v1767_v60 = vmul.f32 %v4165_v2, %v4726_v26  ;;  %v2097_v3 = vpack.c.bf16 %v2058_v29, %v2057_v33  ;;  %vm1900_vm12 = vcmp.ge.f32.partialorder %v1836_v41, 0.0  ;;  %v1964_v16 = vmul.f32 0.2, %v1836_v41  ;;  %v4731_v39 = vld [vmem:[#allocation20_spill] sm:$0xff] }
 0x34c   : > { %2960 = vmatprep.mubr.bf16.mxu0 %v2081_v27  ;;  %v2027_v37 = vsel %vm1899_vm11, %v1835_v63, %v1963_v34  ;;  %v1868_v49 = vadd.f32 %v4167_v6, %v1797_v48  ;;  %vm1931_vm13 = vcmp.ge.f32.partialorder %v1867_v24, 0.0  ;;  %v1995_v50 = vmul.f32 0.2, %v1867_v24 }
 0x34d   : > { %v1837_v62 = vadd.f32 %v4167_v6, %v1766_v8  ;;  %2992 = vmatprep.mubr.bf16.mxu1 %v2097_v3  ;;  %v2028_v14 = vsel %vm1900_vm12, %v1836_v41, %v1964_v16  ;;  %v1838_v45 = vadd.f32 %v4167_v6, %v1767_v60  ;;  %v1798_v32 = vmul.f32 %v4165_v2, %v4727_v57  ;;  %v4736_v8 = vld [vmem:[#allocation27_spill] sm:$0xff]  ;;  %v4737_v16 = vld [vmem:[#allocation12_spill] sm:$0xff] }
 0x34e   : > { %v1799_v20 = vmul.f32 %v4165_v2, %v4728_v47  ;;  %v2082_v59 = vpack.c.bf16 %v2028_v14, %v2027_v37  ;;  %vm1932_vm14 = vcmp.ge.f32.partialorder %v1868_v49, 0.0  ;;  %v1996_v23 = vmul.f32 0.2, %v1868_v49 }
 0x34f   : > { %v2059_v13 = vsel %vm1931_vm13, %v1867_v24, %v1995_v50  ;;  %vm1901_vm15 = vcmp.ge.f32.partialorder %v1837_v62, 0.0  ;;  %vm1902_vm0 = vcmp.ge.f32.partialorder %v1838_v45, 0.0  ;;  %v1965_v12 = vmul.f32 0.2, %v1837_v62 }
 0x350   : > { %v1966_v44 = vmul.f32 0.2, %v1838_v45  ;;  %v2060_v46 = vsel %vm1932_vm14, %v1868_v49, %v1996_v23  ;;  %v1869_v22 = vadd.f32 %v4167_v6, %v1798_v32  ;;  %v1870_v1 = vadd.f32 %v4167_v6, %v1799_v20  ;;  %v4738_v49 = vld [vmem:[#allocation14_spill] sm:$0xff] }
 0x351   : > { %v1768_v25 = vmul.f32 %v4729_v53, %v4165_v2  ;;  %v2098_v7 = vpack.c.bf16 %v2060_v46, %v2059_v13  ;;  %v2029_v56 = vsel %vm1901_vm15, %v1837_v62, %v1965_v12  ;;  %v1769_v55 = vmul.f32 %v4730_v10, %v4165_v2  ;;  %v4739_v13 = vld [vmem:[#allocation24_spill] sm:$0xff] }
 0x352   : > { %v2030_v51 = vsel %vm1902_vm0, %v1838_v45, %v1966_v44  ;;  %vm1933_vm1 = vcmp.ge.f32.partialorder %v1869_v22, 0.0  ;;  %vm1934_vm2 = vcmp.ge.f32.partialorder %v1870_v1, 0.0  ;;  %v1997_v19 = vmul.f32 0.2, %v1869_v22 }
 0x353   : > { %2961 = vmatmul.mubr.bf16.gmra.mrb[16].mxu0 %v2082_v59  ;;  %v2083_v15 = vpack.c.bf16 %v2030_v51, %v2029_v56  ;;  %2993 = vmatmul.mubr.bf16.gmra.mrb[16].mxu1 %v2098_v7  ;;  %v1998_v38 = vmul.f32 0.2, %v1870_v1  ;;  %v1839_v58 = vadd.f32 %v4167_v6, %v1768_v25  ;;  %v1840_v21 = vadd.f32 %v4167_v6, %v1769_v55  ;;  %v4741_v55 = vld [vmem:[#allocation17_spill] sm:$0xff] }
 0x354   : > { %v1800_v42 = vmul.f32 %v4731_v39, %v4165_v2  ;;  %v2061_v28 = vsel %vm1933_vm1, %v1869_v22, %v1997_v19  ;;  %v1801_v35 = vmul.f32 %v4732_v18, %v4165_v2  ;;  %v1770_v4 = vmul.f32 %v4165_v2, %v4733_v11  ;;  %v4740_v22 = vld [vmem:[#allocation26_spill] sm:$0xff]  ;;  %v4743_v11 = vld [vmem:[#allocation29_spill] sm:$0xff] }
 0x355   : > { %2964 = vmatprep.mubr.bf16.mxu0 %v2083_v15  ;;  %v1771_v30 = vmul.f32 %v4165_v2, %v4734_v36  ;;  %v2062_v0 = vsel %vm1934_vm2, %v1870_v1, %v1998_v38  ;;  %vm1903_vm3 = vcmp.ge.f32.partialorder %v1839_v58, 0.0  ;;  %vm1904_vm4 = vcmp.ge.f32.partialorder %v1840_v21, 0.0  ;;  %v4744_v36 = vld [vmem:[#allocation31_spill] sm:$0xff] }
 0x356   : > { %v1967_v40 = vmul.f32 0.2, %v1839_v58  ;;  %v2099_v5 = vpack.c.bf16 %v2062_v0, %v2061_v28  ;;  %v1968_v43 = vmul.f32 0.2, %v1840_v21  ;;  %v1871_v61 = vadd.f32 %v4167_v6, %v1800_v42 }
 0x357   : > { %v1872_v52 = vadd.f32 %v4167_v6, %v1801_v35  ;;  %v1841_v9 = vadd.f32 %v4167_v6, %v1770_v4  ;;  %v1842_v63 = vadd.f32 %v4167_v6, %v1771_v30  ;;  %v1802_v27 = vmul.f32 %v4165_v2, %v4735_v54  ;;  %v4746_v54 = vld [vmem:[#allocation18_spill] sm:$0xff] }
 0x358   : > { %v2031_v31 = vsel %vm1903_vm3, %v1839_v58, %v1967_v40  ;;  %2996 = vmatprep.mubr.bf16.mxu1 %v2099_v5  ;;  %v2032_v17 = vsel %vm1904_vm4, %v1840_v21, %v1968_v43  ;;  %vm1935_vm5 = vcmp.ge.f32.partialorder %v1871_v61, 0.0  ;;  %v1999_v33 = vmul.f32 0.2, %v1871_v61  ;;  %v4742_v58 = vld [vmem:[#allocation19_spill] sm:$0xff]  ;;  %v4745_v5 = vld [vmem:[#allocation16_spill] sm:$0xff] }
 0x359   : > { %vm1936_vm6 = vcmp.ge.f32.partialorder %v1872_v52, 0.0  ;;  %v2084_v41 = vpack.c.bf16 %v2032_v17, %v2031_v31  ;;  %v2000_v34 = vmul.f32 0.2, %v1872_v52  ;;  %vm1905_vm7 = vcmp.ge.f32.partialorder %v1841_v9, 0.0 }
 0x35a   : > { %vm1906_vm8 = vcmp.ge.f32.partialorder %v1842_v63, 0.0  ;;  %v2063_v48 = vsel %vm1935_vm5, %v1871_v61, %v1999_v33  ;;  %v1969_v29 = vmul.f32 0.2, %v1841_v9  ;;  %v1970_v24 = vmul.f32 0.2, %v1842_v63 }
 0x35b   : > { %v1803_v26 = vmul.f32 %v4165_v2, %v4736_v8  ;;  %2965 = vmatmul.mubr.bf16.gmra.mrb[20].mxu0 %v2084_v41  ;;  %v2064_v60 = vsel %vm1936_vm6, %v1872_v52, %v2000_v34  ;;  %v1873_v3 = vadd.f32 %v4167_v6, %v1802_v27  ;;  %v1772_v37 = vmul.f32 %v4737_v16, %v4165_v2  ;;  %v4747_v34 = vld [vmem:[#allocation28_spill] sm:$0xff] }
 0x35c   : > { %v1773_v50 = vmul.f32 %v4738_v49, %v4165_v2  ;;  %v2100_v62 = vpack.c.bf16 %v2064_v60, %v2063_v48  ;;  %v2033_v14 = vsel %vm1905_vm7, %v1841_v9, %v1969_v29  ;;  %v2034_v45 = vsel %vm1906_vm8, %v1842_v63, %v1970_v24 }
 0x35d   : > { %v1874_v57 = vadd.f32 %v4167_v6, %v1803_v26  ;;  %v2085_v32 = vpack.c.bf16 %v2034_v45, %v2033_v14  ;;  %vm1937_vm9 = vcmp.ge.f32.partialorder %v1873_v3, 0.0  ;;  %v2001_v47 = vmul.f32 0.2, %v1873_v3 }
 0x35e   : > { %v1843_v20 = vadd.f32 %v4167_v6, %v1772_v37  ;;  %2997 = vmatmul.mubr.bf16.gmra.mrb[20].mxu1 %v2100_v62  ;;  %v1844_v23 = vadd.f32 %v4167_v6, %v1773_v50  ;;  %v1804_v12 = vmul.f32 %v4739_v13, %v4165_v2  ;;  %v1805_v1 = vmul.f32 %v4740_v22, %v4165_v2 }
 0x35f   : > { %vm1938_vm10 = vcmp.ge.f32.partialorder %v1874_v57, 0.0  ;;  %v2002_v59 = vmul.f32 0.2, %v1874_v57  ;;  %2968 = vmatprep.mubr.bf16.mxu0 %v2085_v32  ;;  %v2065_v44 = vsel %vm1937_vm9, %v1873_v3, %v2001_v47  ;;  %v1774_v15 = vmul.f32 %v4165_v2, %v4741_v55  ;;  %v4748_v3 = vld [vmem:[#allocation30_spill] sm:$0xff] }
 0x360   : > { %vm1907_vm11 = vcmp.ge.f32.partialorder %v1843_v20, 0.0  ;;  %v1971_v46 = vmul.f32 0.2, %v1843_v20  ;;  %vm1908_vm12 = vcmp.ge.f32.partialorder %v1844_v23, 0.0  ;;  %v1972_v25 = vmul.f32 0.2, %v1844_v23 }
 0x361   : > { %v2066_v53 = vsel %vm1938_vm10, %v1874_v57, %v2002_v59  ;;  %v1875_v7 = vadd.f32 %v4167_v6, %v1804_v12  ;;  %v1876_v10 = vadd.f32 %v4167_v6, %v1805_v1  ;;  %v1775_v21 = vmul.f32 %v4165_v2, %v4742_v58 }
 0x362   : > { %v2101_v56 = vpack.c.bf16 %v2066_v53, %v2065_v44  ;;  %v2035_v51 = vsel %vm1907_vm11, %v1843_v20, %v1971_v46  ;;  %v2036_v19 = vsel %vm1908_vm12, %v1844_v23, %v1972_v25  ;;  %v1845_v28 = vadd.f32 %v4167_v6, %v1774_v15 }
 0x363   : > { %vm1939_vm13 = vcmp.ge.f32.partialorder %v1875_v7, 0.0  ;;  %v2003_v38 = vmul.f32 0.2, %v1875_v7  ;;  %v2086_v39 = vpack.c.bf16 %v2036_v19, %v2035_v51  ;;  %vm1940_vm14 = vcmp.ge.f32.partialorder %v1876_v10, 0.0 }
 0x364   : > { %3000 = vmatprep.mubr.bf16.mxu1 %v2101_v56  ;;  %v2004_v42 = vmul.f32 0.2, %v1876_v10  ;;  %v1846_v35 = vadd.f32 %v4167_v6, %v1775_v21  ;;  %v1806_v4 = vmul.f32 %v4165_v2, %v4743_v11  ;;  %v1807_v30 = vmul.f32 %v4165_v2, %v4744_v36 }
 0x365   : > { %v2067_v18 = vsel %vm1939_vm13, %v1875_v7, %v2003_v38  ;;  %2969 = vmatmul.mubr.bf16.gmra.mrb[24].mxu0 %v2086_v39  ;;  %vm1909_vm15 = vcmp.ge.f32.partialorder %v1845_v28, 0.0  ;;  %v1973_v40 = vmul.f32 0.2, %v1845_v28  ;;  %v1776_v43 = vmul.f32 %v4745_v5, %v4165_v2 }
 0x366   : > { %v2068_v0 = vsel %vm1940_vm14, %v1876_v10, %v2004_v42  ;;  %vm1910_vm0 = vcmp.ge.f32.partialorder %v1846_v35, 0.0  ;;  %v1974_v52 = vmul.f32 0.2, %v1846_v35  ;;  %v1877_v31 = vadd.f32 %v4167_v6, %v1806_v4 }
 0x367   : > { %v2102_v61 = vpack.c.bf16 %v2068_v0, %v2067_v18  ;;  %v2037_v9 = vsel %vm1909_vm15, %v1845_v28, %v1973_v40  ;;  %v1878_v63 = vadd.f32 %v4167_v6, %v1807_v30  ;;  %v1777_v27 = vmul.f32 %v4746_v54, %v4165_v2 }
 0x368   : > { %v1847_v17 = vadd.f32 %v4167_v6, %v1776_v43  ;;  %v2038_v33 = vsel %vm1910_vm0, %v1846_v35, %v1974_v52  ;;  %vm1941_vm1 = vcmp.ge.f32.partialorder %v1877_v31, 0.0  ;;  %v2005_v41 = vmul.f32 0.2, %v1877_v31 }
 0x369   : > { %3001 = vmatmul.mubr.bf16.gmra.mrb[24].mxu1 %v2102_v61  ;;  %v1808_v48 = vmul.f32 %v4747_v34, %v4165_v2  ;;  %v2087_v29 = vpack.c.bf16 %v2038_v33, %v2037_v9  ;;  %vm1942_vm2 = vcmp.ge.f32.partialorder %v1878_v63, 0.0  ;;  %v2006_v24 = vmul.f32 0.2, %v1878_v63 }
 0x36a   : > { %v1848_v8 = vadd.f32 %v4167_v6, %v1777_v27  ;;  %v2069_v26 = vsel %vm1941_vm1, %v1877_v31, %v2005_v41  ;;  %vm1911_vm3 = vcmp.ge.f32.partialorder %v1847_v17, 0.0  ;;  %v1975_v60 = vmul.f32 0.2, %v1847_v17 }
 0x36b   : > { %v1809_v16 = vmul.f32 %v4748_v3, %v4165_v2  ;;  %2972 = vmatprep.mubr.bf16.mxu0 %v2087_v29  ;;  %v2070_v37 = vsel %vm1942_vm2, %v1878_v63, %v2006_v24  ;;  %v1879_v50 = vadd.f32 %v4167_v6, %v1808_v48  ;;  %vm2458_vm7 = vcmask 7168  }
 0x36c   : > { %vm1912_vm4 = vcmp.ge.f32.partialorder %v1848_v8, 0.0  ;;  %v1976_v49 = vmul.f32 0.2, %v1848_v8  ;;  %v2103_v62 = vpack.c.bf16 %v2070_v37, %v2069_v26  ;;  %v2039_v14 = vsel %vm1911_vm3, %v1847_v17, %v1975_v60 }
 0x36d   : > { %v1880_v45 = vadd.f32 %v4167_v6, %v1809_v16  ;;  %vm1943_vm5 = vcmp.ge.f32.partialorder %v1879_v50, 0.0  ;;  %v2007_v32 = vmul.f32 0.2, %v1879_v50 }
 0x36e   : > { %v2040_v57 = vsel %vm1912_vm4, %v1848_v8, %v1976_v49  ;;  %3004 = vmatprep.mubr.bf16.mxu1 %v2103_v62 }
 0x36f   : > { %v2088_v47 = vpack.c.bf16 %v2040_v57, %v2039_v14  ;;  %vm1944_vm6 = vcmp.ge.f32.partialorder %v1880_v45, 0.0  ;;  %v2008_v20 = vmul.f32 0.2, %v1880_v45  ;;  %v2071_v59 = vsel %vm1943_vm5, %v1879_v50, %v2007_v32 }
 0x371   : > { %2973 = vmatmul.mubr.bf16.gmra.mrb[28].mxu0 %v2088_v47  ;;  %v2072_v2 = vsel %vm1944_vm6, %v1880_v45, %v2008_v20 }
 0x372   : > { %v2104_v23 = vpack.c.bf16 %v2072_v2, %v2071_v59 }
 0x374   : > { %3005 = vmatmul.mubr.bf16.gmra.mrb[28].mxu1 %v2104_v23 }
 0x406   : > { %v2946_v13 = vpop.f32.mrb[0].mxu0  ;;  %v2978_v12 = vpop.f32.mrb[0].mxu1 }
 0x407   : > { %2461 = vst.msk [vmem:[%s4658_s7 + $0x10] sm:$0xff] %vm2458_vm7, %v2946_v13  ;;  %2493 = vst.msk [vmem:[%s4658_s7 + $0x110] sm:$0xff] %vm2458_vm7, %v2978_v12  ;;  %v2203_v6 = vpop.f32.mrb[1].mxu0  ;;  %v2331_v44 = vpop.f32.mrb[1].mxu1 }
 0x408   : > { %2459 = vst.msk [vmem:[%s4658_s7] sm:$0xff] %vm2458_vm7, %v2203_v6  ;;  %2491 = vst.msk [vmem:[%s4658_s7 + $0x100] sm:$0xff] %vm2458_vm7, %v2331_v44  ;;  %v2947_v46 = vpop.f32.mrb[2].mxu0  ;;  %v2979_v22 = vpop.f32.mrb[2].mxu1 }
 0x409   : > { %2462 = vst.msk [vmem:[%s4658_s7 + $0x18] sm:$0xff] %vm2458_vm7, %v2947_v46  ;;  %2494 = vst.msk [vmem:[%s4658_s7 + $0x118] sm:$0xff] %vm2458_vm7, %v2979_v22  ;;  %v2206_v1 = vpop.f32.mrb[3].mxu0  ;;  %v2334_v53 = vpop.f32.mrb[3].mxu1 }
 0x40a   : > { %2460 = vst.msk [vmem:[%s4658_s7 + $0x8] sm:$0xff] %vm2458_vm7, %v2206_v1  ;;  %2492 = vst.msk [vmem:[%s4658_s7 + $0x108] sm:$0xff] %vm2458_vm7, %v2334_v53 }
 0x40e   : > { %v2950_v25 = vpop.f32.mrb[4].mxu0  ;;  %v2982_v7 = vpop.f32.mrb[4].mxu1 }
 0x40f   : > { %2465 = vst.msk [vmem:[%s4658_s7 + $0x30] sm:$0xff] %vm2458_vm7, %v2950_v25  ;;  %2497 = vst.msk [vmem:[%s4658_s7 + $0x130] sm:$0xff] %vm2458_vm7, %v2982_v7  ;;  %v2219_v56 = vpop.f32.mrb[5].mxu0  ;;  %v2347_v51 = vpop.f32.mrb[5].mxu1 }
 0x410   : > { %2463 = vst.msk [vmem:[%s4658_s7 + $0x20] sm:$0xff] %vm2458_vm7, %v2219_v56  ;;  %2495 = vst.msk [vmem:[%s4658_s7 + $0x120] sm:$0xff] %vm2458_vm7, %v2347_v51  ;;  %v2951_v10 = vpop.f32.mrb[6].mxu0  ;;  %v2983_v55 = vpop.f32.mrb[6].mxu1 }
 0x411   : > { %2466 = vst.msk [vmem:[%s4658_s7 + $0x38] sm:$0xff] %vm2458_vm7, %v2951_v10  ;;  %2498 = vst.msk [vmem:[%s4658_s7 + $0x138] sm:$0xff] %vm2458_vm7, %v2983_v55  ;;  %v2222_v15 = vpop.f32.mrb[7].mxu0  ;;  %v2350_v19 = vpop.f32.mrb[7].mxu1 }
 0x412   : > { %2464 = vst.msk [vmem:[%s4658_s7 + $0x28] sm:$0xff] %vm2458_vm7, %v2222_v15  ;;  %2496 = vst.msk [vmem:[%s4658_s7 + $0x128] sm:$0xff] %vm2458_vm7, %v2350_v19 }
 0x416   : > { %v2954_v38 = vpop.f32.mrb[8].mxu0  ;;  %v2986_v58 = vpop.f32.mrb[8].mxu1 }
 0x417   : > { %2469 = vst.msk [vmem:[%s4658_s7 + $0x50] sm:$0xff] %vm2458_vm7, %v2954_v38  ;;  %2501 = vst.msk [vmem:[%s4658_s7 + $0x150] sm:$0xff] %vm2458_vm7, %v2986_v58  ;;  %v2235_v21 = vpop.f32.mrb[9].mxu0  ;;  %v2363_v39 = vpop.f32.mrb[9].mxu1 }
 0x418   : > { %2467 = vst.msk [vmem:[%s4658_s7 + $0x40] sm:$0xff] %vm2458_vm7, %v2235_v21  ;;  %2499 = vst.msk [vmem:[%s4658_s7 + $0x140] sm:$0xff] %vm2458_vm7, %v2363_v39  ;;  %v2955_v42 = vpop.f32.mrb[10].mxu0  ;;  %v2987_v28 = vpop.f32.mrb[10].mxu1 }
 0x419   : > { %2470 = vst.msk [vmem:[%s4658_s7 + $0x58] sm:$0xff] %vm2458_vm7, %v2955_v42  ;;  %2502 = vst.msk [vmem:[%s4658_s7 + $0x158] sm:$0xff] %vm2458_vm7, %v2987_v28  ;;  %v2238_v18 = vpop.f32.mrb[11].mxu0  ;;  %v2366_v35 = vpop.f32.mrb[11].mxu1 }
 0x41a   : > { %2468 = vst.msk [vmem:[%s4658_s7 + $0x48] sm:$0xff] %vm2458_vm7, %v2238_v18  ;;  %2500 = vst.msk [vmem:[%s4658_s7 + $0x148] sm:$0xff] %vm2458_vm7, %v2366_v35 }
 0x41e   : > { %v2958_v11 = vpop.f32.mrb[12].mxu0  ;;  %v2990_v4 = vpop.f32.mrb[12].mxu1 }
 0x41f   : > { %2473 = vst.msk [vmem:[%s4658_s7 + $0x70] sm:$0xff] %vm2458_vm7, %v2958_v11  ;;  %2505 = vst.msk [vmem:[%s4658_s7 + $0x170] sm:$0xff] %vm2458_vm7, %v2990_v4  ;;  %v2251_v36 = vpop.f32.mrb[13].mxu0  ;;  %v2379_v30 = vpop.f32.mrb[13].mxu1 }
 0x420   : > { %2471 = vst.msk [vmem:[%s4658_s7 + $0x60] sm:$0xff] %vm2458_vm7, %v2251_v36  ;;  %2503 = vst.msk [vmem:[%s4658_s7 + $0x160] sm:$0xff] %vm2458_vm7, %v2379_v30  ;;  %v2959_v0 = vpop.f32.mrb[14].mxu0  ;;  %v2991_v40 = vpop.f32.mrb[14].mxu1 }
 0x421   : > { %2474 = vst.msk [vmem:[%s4658_s7 + $0x78] sm:$0xff] %vm2458_vm7, %v2959_v0  ;;  %2506 = vst.msk [vmem:[%s4658_s7 + $0x178] sm:$0xff] %vm2458_vm7, %v2991_v40  ;;  %v2254_v5 = vpop.f32.mrb[15].mxu0  ;;  %v2382_v43 = vpop.f32.mrb[15].mxu1 }
 0x422   : > { %2472 = vst.msk [vmem:[%s4658_s7 + $0x68] sm:$0xff] %vm2458_vm7, %v2254_v5  ;;  %2504 = vst.msk [vmem:[%s4658_s7 + $0x168] sm:$0xff] %vm2458_vm7, %v2382_v43 }
 0x426   : > { %v2962_v61 = vpop.f32.mrb[16].mxu0  ;;  %v2994_v9 = vpop.f32.mrb[16].mxu1 }
 0x427   : > { %2477 = vst.msk [vmem:[%s4658_s7 + $0x90] sm:$0xff] %vm2458_vm7, %v2962_v61  ;;  %v2267_v52 = vpop.f32.mrb[17].mxu0  ;;  %2509 = vst.msk [vmem:[%s4658_s7 + $0x190] sm:$0xff] %vm2458_vm7, %v2994_v9  ;;  %v2395_v54 = vpop.f32.mrb[17].mxu1 }
 0x428   : > { %2475 = vst.msk [vmem:[%s4658_s7 + $0x80] sm:$0xff] %vm2458_vm7, %v2267_v52  ;;  %v2963_v31 = vpop.f32.mrb[18].mxu0  ;;  %2507 = vst.msk [vmem:[%s4658_s7 + $0x180] sm:$0xff] %vm2458_vm7, %v2395_v54  ;;  %v2995_v27 = vpop.f32.mrb[18].mxu1 }
 0x429   : > { %2478 = vst.msk [vmem:[%s4658_s7 + $0x98] sm:$0xff] %vm2458_vm7, %v2963_v31  ;;  %v2270_v63 = vpop.f32.mrb[19].mxu0  ;;  %2510 = vst.msk [vmem:[%s4658_s7 + $0x198] sm:$0xff] %vm2458_vm7, %v2995_v27  ;;  %v2398_v17 = vpop.f32.mrb[19].mxu1 }
 0x42a   : > { %2476 = vst.msk [vmem:[%s4658_s7 + $0x88] sm:$0xff] %vm2458_vm7, %v2270_v63  ;;  %2508 = vst.msk [vmem:[%s4658_s7 + $0x188] sm:$0xff] %vm2458_vm7, %v2398_v17 }
 0x42e   : > { %v2966_v33 = vpop.f32.mrb[20].mxu0 }
 0x42f   : > { %2481 = vst.msk [vmem:[%s4658_s7 + $0xb0] sm:$0xff] %vm2458_vm7, %v2966_v33  ;;  %v2283_v41 = vpop.f32.mrb[21].mxu0 }
 0x430   : > { %2479 = vst.msk [vmem:[%s4658_s7 + $0xa0] sm:$0xff] %vm2458_vm7, %v2283_v41  ;;  %v2967_v34 = vpop.f32.mrb[22].mxu0 }
 0x431   : > { %v2998_v48 = vpop.f32.mrb[20].mxu1  ;;  %2482 = vst.msk [vmem:[%s4658_s7 + $0xb8] sm:$0xff] %vm2458_vm7, %v2967_v34  ;;  %v2286_v29 = vpop.f32.mrb[23].mxu0 }
 0x432   : > { %2513 = vst.msk [vmem:[%s4658_s7 + $0x1b0] sm:$0xff] %vm2458_vm7, %v2998_v48  ;;  %v2411_v24 = vpop.f32.mrb[21].mxu1  ;;  %2480 = vst.msk [vmem:[%s4658_s7 + $0xa8] sm:$0xff] %vm2458_vm7, %v2286_v29 }
 0x433   : > { %2511 = vst.msk [vmem:[%s4658_s7 + $0x1a0] sm:$0xff] %vm2458_vm7, %v2411_v24  ;;  %v2999_v8 = vpop.f32.mrb[22].mxu1 }
 0x434   : > { %2514 = vst.msk [vmem:[%s4658_s7 + $0x1b8] sm:$0xff] %vm2458_vm7, %v2999_v8  ;;  %v2414_v26 = vpop.f32.mrb[23].mxu1 }
 0x435   : > { %2512 = vst.msk [vmem:[%s4658_s7 + $0x1a8] sm:$0xff] %vm2458_vm7, %v2414_v26 }
 0x438   : > { %v2970_v60 = vpop.f32.mrb[24].mxu0 }
 0x439   : > { %2485 = vst.msk [vmem:[%s4658_s7 + $0xd0] sm:$0xff] %vm2458_vm7, %v2970_v60  ;;  %v2299_v3 = vpop.f32.mrb[25].mxu0 }
 0x43a   : > { %2483 = vst.msk [vmem:[%s4658_s7 + $0xc0] sm:$0xff] %vm2458_vm7, %v2299_v3  ;;  %v2971_v16 = vpop.f32.mrb[26].mxu0 }
 0x43b   : > { %2486 = vst.msk [vmem:[%s4658_s7 + $0xd8] sm:$0xff] %vm2458_vm7, %v2971_v16  ;;  %v2302_v49 = vpop.f32.mrb[27].mxu0 }
 0x43c   : > { %v3002_v37 = vpop.f32.mrb[24].mxu1  ;;  %2484 = vst.msk [vmem:[%s4658_s7 + $0xc8] sm:$0xff] %vm2458_vm7, %v2302_v49 }
 0x43d   : > { %2517 = vst.msk [vmem:[%s4658_s7 + $0x1d0] sm:$0xff] %vm2458_vm7, %v3002_v37  ;;  %v2427_v50 = vpop.f32.mrb[25].mxu1 }
 0x43e   : > { %2515 = vst.msk [vmem:[%s4658_s7 + $0x1c0] sm:$0xff] %vm2458_vm7, %v2427_v50  ;;  %v3003_v62 = vpop.f32.mrb[26].mxu1 }
 0x43f   : > { %2518 = vst.msk [vmem:[%s4658_s7 + $0x1d8] sm:$0xff] %vm2458_vm7, %v3003_v62  ;;  %v2430_v14 = vpop.f32.mrb[27].mxu1 }
 0x440   : > { %2516 = vst.msk [vmem:[%s4658_s7 + $0x1c8] sm:$0xff] %vm2458_vm7, %v2430_v14 }
 0x444   : > { %v2974_v45 = vpop.f32.mrb[28].mxu0 }
 0x445   : > { %2489 = vst.msk [vmem:[%s4658_s7 + $0xf0] sm:$0xff] %vm2458_vm7, %v2974_v45  ;;  %v2315_v57 = vpop.f32.mrb[29].mxu0 }
 0x446   : > { %2487 = vst.msk [vmem:[%s4658_s7 + $0xe0] sm:$0xff] %vm2458_vm7, %v2315_v57  ;;  %v2975_v32 = vpop.f32.mrb[30].mxu0 }
 0x447   : > { %v3006_v47 = vpop.f32.mrb[28].mxu1  ;;  %2490 = vst.msk [vmem:[%s4658_s7 + $0xf8] sm:$0xff] %vm2458_vm7, %v2975_v32  ;;  %v2318_v20 = vpop.f32.mrb[31].mxu0 }
 0x448   : > { %2521 = vst.msk [vmem:[%s4658_s7 + $0x1f0] sm:$0xff] %vm2458_vm7, %v3006_v47  ;;  %v2443_v59 = vpop.f32.mrb[29].mxu1  ;;  %2488 = vst.msk [vmem:[%s4658_s7 + $0xe8] sm:$0xff] %vm2458_vm7, %v2318_v20 }
 0x449   : > { %2519 = vst.msk [vmem:[%s4658_s7 + $0x1e0] sm:$0xff] %vm2458_vm7, %v2443_v59  ;;  %v3007_v2 = vpop.f32.mrb[30].mxu1 }
 0x44a   : > { %2522 = vst.msk [vmem:[%s4658_s7 + $0x1f8] sm:$0xff] %vm2458_vm7, %v3007_v2  ;;  %v2446_v23 = vpop.f32.mrb[31].mxu1 }
 0x44b   : > { %2520 = vst.msk [vmem:[%s4658_s7 + $0x1e8] sm:$0xff] %vm2458_vm7, %v2446_v23 }
 0x44c PF: > { %s17_s26 = sadd.s32 1, %s3087_s26   ;;  %s4749_s24 = smov %s3083_s25 }
 0x44d   : > { %p14_p8 = scmp.ge.s32.totalorder %s17_s26, 4   ;;  %s4750_s25 = smov %s4752_s27 }
 0x44f   :  { %16 = sbr.rel (!%p14_p8) target bundleno = 2 (0x2), region = 94 }

</bundles_post_ra>
